<compile_context>
chip_gen: v7x
topology: tpu7x:2x2x1
jax: 0.10.0
libtpu: 0.0.40
codegen_flags: <defaults>
</compile_context>

<pallas_src>
import functools

import jax
import jax.numpy as jnp
from jax import lax
from jax.experimental import pallas as pl
from jax.experimental.pallas import tpu as pltpu


def gat_kernel(T, N,
               h_ref, rel_rec_ref, rel_send_ref, rel_rec_t_ref, rel_send_t_ref,
               w_fc_ref, b_fc_ref, a_r_ref, a_s_ref, a_b_ref,
               hp_ref, a_ref, asym_ref, anorm_ref):
    E = rel_rec_ref.shape[0]
    n_out = w_fc_ref.shape[1]

    def dot(a, b):
        return jnp.dot(a, b, precision=lax.Precision.HIGHEST,
                       preferred_element_type=jnp.float32)

    # --- fc: one wide matmul over all (t, n) rows of this batch element ------
    x = h_ref[0]                                           # [T*N, n_h]
    wh_flat = dot(x, w_fc_ref[...]) + b_fc_ref[...]        # [T*N, n_out]
    wh = wh_flat.reshape(T, N, n_out)                      # time-major Wh

    # --- attention logits ------------------------------------------------------
    # a(edges) = receivers @ a_r + senders @ a_s + a_b; since receivers/senders
    # are linear in Wh, compute per-node scalars and scatter to edges with the
    # relation matrices (one small [T,N]@[N,E] matmul per side).
    sr = jnp.sum(wh * a_r_ref[...][None, :, :], axis=-1)   # [T, N]
    ss = jnp.sum(wh * a_s_ref[...][None, :, :], axis=-1)   # [T, N]
    z = (dot(sr, rel_rec_t_ref[...]) + dot(ss, rel_send_t_ref[...])
         + a_b_ref[...])                                   # [T, E]
    score = jnp.exp(jnp.where(z >= 0, z, 0.2 * z))         # exp(leaky_relu(.,0.2))

    # --- edge scores -> dense adjacency ---------------------------------------
    # A[t] = rel_rec^T @ diag(score[t]) @ rel_send, fused over all t.
    lhs_rec = (score[:, None, :] * rel_rec_t_ref[...][None, :, :]).reshape(T * N, E)
    a_mat = dot(lhs_rec, rel_send_ref[...]).reshape(T, N, N)
    # A[t]^T via the mirrored matmul (avoids an in-kernel [T,N,N] transpose).
    lhs_snd = (score[:, None, :] * rel_send_t_ref[...][None, :, :]).reshape(T * N, E)
    a_mat_t = dot(lhs_snd, rel_rec_ref[...]).reshape(T, N, N)

    # TODO(synk): symmetrize() is not defined in the provided source; using the
    # standard 0.5 * (A + A^T).
    a_sym = 0.5 * (a_mat + a_mat_t)
    a_sum = jnp.sum(a_mat, axis=-1, keepdims=True)         # [T, N, 1]
    a_norm = a_mat / a_sum

    # --- context vectors: h_p[t] = relu(A_norm[t] @ Wh[t]), batched over T -----
    hp = jnp.maximum(
        jnp.einsum('tnm,tmo->tno', a_norm, wh,
                   precision=lax.Precision.HIGHEST,
                   preferred_element_type=jnp.float32),
        0.0)

    hp_ref[0] = hp
    a_ref[0] = a_mat
    asym_ref[0] = a_sym
    anorm_ref[0] = a_norm


def graph_attention_forward(h, rel_rec, rel_send, params):
    """h: [B, N, T, n_h]; rel_rec/rel_send: [E, N].
    Returns (h_p [B,N,T,n_out], A, A_sym, A_norm each [B,T,N,N])."""
    B, N, T, n_h = h.shape
    E = rel_rec.shape[0]
    n_out = params["w_fc"].shape[1]

    # glue: time-major flatten so the kernel's per-timestep [N, *] slices are
    # contiguous sublane blocks (N a multiple of 8 keeps reshapes tile-aligned).
    h_tm = jnp.transpose(h, (0, 2, 1, 3)).reshape(B, T * N, n_h)

    rel_rec = rel_rec.astype(jnp.float32)
    rel_send = rel_send.astype(jnp.float32)
    rel_rec_t = rel_rec.T
    rel_send_t = rel_send.T

    a_w = params["a_w"]
    a_r = a_w[:n_out].reshape(1, n_out)
    a_s = a_w[n_out:].reshape(1, n_out)
    a_b = params["a_b"].reshape(1, 1)

    in_specs = [
        pl.BlockSpec((1, T * N, n_h), lambda b: (b, 0, 0)),   # h (per batch)
        pl.BlockSpec((E, N), lambda b: (0, 0)),               # rel_rec
        pl.BlockSpec((E, N), lambda b: (0, 0)),               # rel_send
        pl.BlockSpec((N, E), lambda b: (0, 0)),               # rel_rec^T
        pl.BlockSpec((N, E), lambda b: (0, 0)),               # rel_send^T
        pl.BlockSpec((n_h, n_out), lambda b: (0, 0)),         # w_fc
        pl.BlockSpec((1, n_out), lambda b: (0, 0)),           # b_fc
        pl.BlockSpec((1, n_out), lambda b: (0, 0)),           # a (receiver half)
        pl.BlockSpec((1, n_out), lambda b: (0, 0)),           # a (sender half)
        pl.BlockSpec((1, 1), lambda b: (0, 0)),               # a bias
    ]
    out_specs = [
        pl.BlockSpec((1, T, N, n_out), lambda b: (b, 0, 0, 0)),
        pl.BlockSpec((1, T, N, N), lambda b: (b, 0, 0, 0)),
        pl.BlockSpec((1, T, N, N), lambda b: (b, 0, 0, 0)),
        pl.BlockSpec((1, T, N, N), lambda b: (b, 0, 0, 0)),
    ]
    out_shape = (
        jax.ShapeDtypeStruct((B, T, N, n_out), jnp.float32),
        jax.ShapeDtypeStruct((B, T, N, N), jnp.float32),
        jax.ShapeDtypeStruct((B, T, N, N), jnp.float32),
        jax.ShapeDtypeStruct((B, T, N, N), jnp.float32),
    )

    hp_perm, A, A_sym, A_norm = pl.pallas_call(
        functools.partial(gat_kernel, T, N),
        grid=(B,),
        in_specs=in_specs,
        out_specs=out_specs,
        out_shape=out_shape,
        compiler_params=pltpu.CompilerParams(
            dimension_semantics=("parallel",)),   # use both TCs on v7x
    )(h_tm, rel_rec, rel_send, rel_rec_t, rel_send_t,
      params["w_fc"], params["b_fc"], a_r, a_s, a_b)

    # glue: [B, T, N, n_out] -> [B, N, T, n_out] (matches torch permute)
    h_p = jnp.transpose(hp_perm, (0, 2, 1, 3))
    return h_p, A, A_sym, A_norm


def reference_forward(h, rel_rec, rel_send, params):
    """Pure-JAX reference mirroring the PyTorch forward op-by-op."""
    hp = lax.Precision.HIGHEST
    B, N, T, _ = h.shape
    E = rel_rec.shape[0]
    n_out = params["w_fc"].shape[1]

    Wh = jnp.einsum('bnth,ho->bnto', h, params["w_fc"], precision=hp) + params["b_fc"]
    Wh_flat = Wh.reshape(B, N, T * n_out)
    receivers = jnp.matmul(rel_rec, Wh_flat, precision=hp).reshape(B, E, T, n_out)
    senders = jnp.matmul(rel_send, Wh_flat, precision=hp).reshape(B, E, T, n_out)
    edges = jnp.concatenate([receivers, senders], axis=-1)
    z = jnp.einsum('betk,k->bet', edges, params["a_w"], precision=hp) + params["a_b"]
    score = jnp.exp(jnp.where(z >= 0, z, 0.2 * z))               # [B, E, T]

    s = jnp.transpose(score, (0, 2, 1))                          # [B, T, E]
    A_de = s[..., :, None] * jnp.eye(E, dtype=jnp.float32)       # diag_embed
    A = jnp.matmul(rel_rec.T,
                   jnp.matmul(A_de, rel_send, precision=hp), precision=hp)  # [B,T,N,N]
    A_sym = 0.5 * (A + jnp.swapaxes(A, -1, -2))
    A_sum = A.sum(-1, keepdims=True)
    A_norm = A / A_sum
    Wh_perm = jnp.transpose(Wh, (0, 2, 1, 3))                    # [B, T, N, n_out]
    h_p = jax.nn.relu(jnp.matmul(A_norm, Wh_perm, precision=hp))
    h_p = jnp.transpose(h_p, (0, 2, 1, 3))
    return h_p, A, A_sym, A_norm


def build_fully_connected_relations(num_atoms):
    """Standard NRI-style one-hot relation matrices (all ordered pairs, no self)."""
    recv = [i for i in range(num_atoms) for j in range(num_atoms) if j != i]
    send = [j for i in range(num_atoms) for j in range(num_atoms) if j != i]
    eye = jnp.eye(num_atoms, dtype=jnp.float32)
    return eye[jnp.array(recv)], eye[jnp.array(send)]


if __name__ == "__main__":
    # small shapes consistent with the module: batch=2, atoms=8, timesteps=8,
    # n_h=32, n_out=16  (N multiple of 8 keeps in-kernel reshapes tile-aligned)
    B, N, T = 2, 8, 8
    n_h, n_out = 32, 16

    key = jax.random.PRNGKey(0)
    kh, k1, k2, k3, k4 = jax.random.split(key, 5)
    h = jax.random.normal(kh, (B, N, T, n_h), jnp.float32)

    s = 0.1
    params = {
        "w_fc": jax.random.normal(k1, (n_h, n_out), jnp.float32) * s,  # [in, out]
        "b_fc": jax.random.normal(k2, (1, n_out), jnp.float32) * s,
        "a_w": jax.random.normal(k3, (2 * n_out,), jnp.float32) * s,
        "a_b": jax.random.normal(k4, (), jnp.float32) * s,
    }

    rel_rec, rel_send = build_fully_connected_relations(N)

    h_p, A, A_sym, A_norm = graph_attention_forward(h, rel_rec, rel_send, params)
    h_p = jax.block_until_ready(h_p)

    assert h_p.shape == (B, N, T, n_out), h_p.shape
    assert A.shape == (B, T, N, N), A.shape
    for t in (h_p, A, A_sym, A_norm):
        assert bool(jnp.all(jnp.isfinite(t)))

    # correctness check against a pure-JAX reference of the PyTorch forward
    r_hp, r_A, r_Asym, r_Anorm = reference_forward(h, rel_rec, rel_send, params)
    for got, ref in ((h_p, r_hp), (A, r_A), (A_sym, r_Asym), (A_norm, r_Anorm)):
        assert bool(jnp.allclose(got, ref, rtol=2e-3, atol=2e-3)), (
            float(jnp.max(jnp.abs(got - ref))))

    print("KERNEL_OK")
</pallas_src>

<mosaic_0001>
module attributes {stable_mosaic.version = 11 : i64} {
  func.func @gat_kernel(%arg0: i32, %arg1: memref<1x64x32xf32, #tpu.memory_space<vmem>>, %arg2: memref<56x8xf32, #tpu.memory_space<vmem>>, %arg3: memref<56x8xf32, #tpu.memory_space<vmem>>, %arg4: memref<8x56xf32, #tpu.memory_space<vmem>>, %arg5: memref<8x56xf32, #tpu.memory_space<vmem>>, %arg6: memref<32x16xf32, #tpu.memory_space<vmem>>, %arg7: memref<1x16xf32, #tpu.memory_space<vmem>>, %arg8: memref<1x16xf32, #tpu.memory_space<vmem>>, %arg9: memref<1x16xf32, #tpu.memory_space<vmem>>, %arg10: memref<1x1xf32, #tpu.memory_space<vmem>>, %arg11: memref<1x8x8x16xf32, #tpu.memory_space<vmem>>, %arg12: memref<1x8x8x8xf32, #tpu.memory_space<vmem>>, %arg13: memref<1x8x8x8xf32, #tpu.memory_space<vmem>>, %arg14: memref<1x8x8x8xf32, #tpu.memory_space<vmem>>) attributes {dimension_semantics = [#tpu.dimension_semantics<parallel>], iteration_bounds = array<i64: 2>, scalar_prefetch = 0 : i64, scratch_operands = 0 : i64, tpu.core_type = #tpu.core_type<tc>, window_params = [{transform_indices = @transform_0, window_bounds = array<i64: 1, 64, 32>}, {pipeline_mode = #tpu.pipeline_mode<synchronous>, transform_indices = @transform_1, window_bounds = array<i64: 56, 8>}, {pipeline_mode = #tpu.pipeline_mode<synchronous>, transform_indices = @transform_2, window_bounds = array<i64: 56, 8>}, {pipeline_mode = #tpu.pipeline_mode<synchronous>, transform_indices = @transform_3, window_bounds = array<i64: 8, 56>}, {pipeline_mode = #tpu.pipeline_mode<synchronous>, transform_indices = @transform_4, window_bounds = array<i64: 8, 56>}, {pipeline_mode = #tpu.pipeline_mode<synchronous>, transform_indices = @transform_5, window_bounds = array<i64: 32, 16>}, {pipeline_mode = #tpu.pipeline_mode<synchronous>, transform_indices = @transform_6, window_bounds = array<i64: 1, 16>}, {pipeline_mode = #tpu.pipeline_mode<synchronous>, transform_indices = @transform_7, window_bounds = array<i64: 1, 16>}, {pipeline_mode = #tpu.pipeline_mode<synchronous>, transform_indices = @transform_8, window_bounds = array<i64: 1, 16>}, {pipeline_mode = #tpu.pipeline_mode<synchronous>, transform_indices = @transform_9, window_bounds = array<i64: 1, 1>}, {transform_indices = @transform_10, window_bounds = array<i64: 1, 8, 8, 16>}, {transform_indices = @transform_11, window_bounds = array<i64: 1, 8, 8, 8>}, {transform_indices = @transform_12, window_bounds = array<i64: 1, 8, 8, 8>}, {transform_indices = @transform_13, window_bounds = array<i64: 1, 8, 8, 8>}]} {
    %c0 = arith.constant 0 : index
    %c0_0 = arith.constant 0 : index
    %c0_1 = arith.constant 0 : index
    %0 = vector.load %arg1[%c0, %c0_0, %c0_1] : memref<1x64x32xf32, #tpu.memory_space<vmem>>, vector<1x64x32xf32>
    %1 = vector.shape_cast %0 : vector<1x64x32xf32> to vector<64x32xf32>
    %c0_2 = arith.constant 0 : index
    %c0_3 = arith.constant 0 : index
    %2 = vector.load %arg6[%c0_2, %c0_3] : memref<32x16xf32, #tpu.memory_space<vmem>>, vector<32x16xf32>
    %cst = arith.constant dense<0.000000e+00> : vector<64x16xf32>
    %3 = tpu.matmul %1, %2, %cst {dimension_numbers = #tpu.dot_dimension_numbers<[1], [0], [0], [1], [0, 0, 1, 1], [], []>, precision = #tpu.contract_precision<fp32>} : vector<64x32xf32>, vector<32x16xf32>, vector<64x16xf32> -> vector<64x16xf32>
    %c0_4 = arith.constant 0 : index
    %c0_5 = arith.constant 0 : index
    %4 = vector.load %arg7[%c0_4, %c0_5] : memref<1x16xf32, #tpu.memory_space<vmem>>, vector<1x16xf32>
    %5 = vector.broadcast %4 : vector<1x16xf32> to vector<64x16xf32>
    %6 = arith.addf %3, %5 : vector<64x16xf32>
    %7 = vector.shape_cast %6 : vector<64x16xf32> to vector<8x8x16xf32>
    %c0_6 = arith.constant 0 : index
    %c0_7 = arith.constant 0 : index
    %8 = vector.load %arg8[%c0_6, %c0_7] : memref<1x16xf32, #tpu.memory_space<vmem>>, vector<1x16xf32>
    %9 = vector.shape_cast %8 : vector<1x16xf32> to vector<1x1x16xf32>
    %10 = vector.broadcast %9 : vector<1x1x16xf32> to vector<8x8x16xf32>
    %11 = arith.mulf %7, %10 : vector<8x8x16xf32>
    %cst_8 = arith.constant dense<0.000000e+00> : vector<8x8xf32>
    %12 = vector.multi_reduction <add>, %11, %cst_8 [2] : vector<8x8x16xf32> to vector<8x8xf32>
    %c0_9 = arith.constant 0 : index
    %c0_10 = arith.constant 0 : index
    %13 = vector.load %arg9[%c0_9, %c0_10] : memref<1x16xf32, #tpu.memory_space<vmem>>, vector<1x16xf32>
    %14 = vector.shape_cast %13 : vector<1x16xf32> to vector<1x1x16xf32>
    %15 = vector.broadcast %14 : vector<1x1x16xf32> to vector<8x8x16xf32>
    %16 = arith.mulf %7, %15 : vector<8x8x16xf32>
    %cst_11 = arith.constant dense<0.000000e+00> : vector<8x8xf32>
    %17 = vector.multi_reduction <add>, %16, %cst_11 [2] : vector<8x8x16xf32> to vector<8x8xf32>
    %c0_12 = arith.constant 0 : index
    %c0_13 = arith.constant 0 : index
    %18 = vector.load %arg4[%c0_12, %c0_13] : memref<8x56xf32, #tpu.memory_space<vmem>>, vector<8x56xf32>
    %cst_14 = arith.constant dense<0.000000e+00> : vector<8x56xf32>
    %19 = tpu.matmul %12, %18, %cst_14 {dimension_numbers = #tpu.dot_dimension_numbers<[1], [0], [0], [1], [0, 0, 1, 1], [], []>, precision = #tpu.contract_precision<fp32>} : vector<8x8xf32>, vector<8x56xf32>, vector<8x56xf32> -> vector<8x56xf32>
    %c0_15 = arith.constant 0 : index
    %c0_16 = arith.constant 0 : index
    %20 = vector.load %arg5[%c0_15, %c0_16] : memref<8x56xf32, #tpu.memory_space<vmem>>, vector<8x56xf32>
    %cst_17 = arith.constant dense<0.000000e+00> : vector<8x56xf32>
    %21 = tpu.matmul %17, %20, %cst_17 {dimension_numbers = #tpu.dot_dimension_numbers<[1], [0], [0], [1], [0, 0, 1, 1], [], []>, precision = #tpu.contract_precision<fp32>} : vector<8x8xf32>, vector<8x56xf32>, vector<8x56xf32> -> vector<8x56xf32>
    %22 = arith.addf %19, %21 : vector<8x56xf32>
    %c0_18 = arith.constant 0 : index
    %c0_19 = arith.constant 0 : index
    %23 = vector.load %arg10[%c0_18, %c0_19] : memref<1x1xf32, #tpu.memory_space<vmem>>, vector<1x1xf32>
    %24 = vector.broadcast %23 : vector<1x1xf32> to vector<8x56xf32>
    %25 = arith.addf %22, %24 : vector<8x56xf32>
    %cst_20 = arith.constant 0.000000e+00 : f32
    %26 = vector.broadcast %cst_20 : f32 to vector<8x56xf32>
    %27 = arith.cmpf oge, %25, %26 : vector<8x56xf32>
    %cst_21 = arith.constant 2.000000e-01 : f32
    %28 = vector.broadcast %cst_21 : f32 to vector<8x56xf32>
    %29 = arith.mulf %28, %25 : vector<8x56xf32>
    %30 = arith.select %27, %25, %29 : vector<8x56xi1>, vector<8x56xf32>
    %31 = math.exp %30 : vector<8x56xf32>
    %32 = vector.shape_cast %31 : vector<8x56xf32> to vector<8x1x56xf32>
    %c0_22 = arith.constant 0 : index
    %c0_23 = arith.constant 0 : index
    %33 = vector.load %arg4[%c0_22, %c0_23] : memref<8x56xf32, #tpu.memory_space<vmem>>, vector<8x56xf32>
    %34 = vector.shape_cast %33 : vector<8x56xf32> to vector<1x8x56xf32>
    %35 = vector.broadcast %32 : vector<8x1x56xf32> to vector<8x8x56xf32>
    %36 = vector.broadcast %34 : vector<1x8x56xf32> to vector<8x8x56xf32>
    %37 = arith.mulf %35, %36 : vector<8x8x56xf32>
    %38 = vector.shape_cast %37 : vector<8x8x56xf32> to vector<64x56xf32>
    %c0_24 = arith.constant 0 : index
    %c0_25 = arith.constant 0 : index
    %39 = vector.load %arg3[%c0_24, %c0_25] : memref<56x8xf32, #tpu.memory_space<vmem>>, vector<56x8xf32>
    %cst_26 = arith.constant dense<0.000000e+00> : vector<64x8xf32>
    %40 = tpu.matmul %38, %39, %cst_26 {dimension_numbers = #tpu.dot_dimension_numbers<[1], [0], [0], [1], [0, 0, 1, 1], [], []>, precision = #tpu.contract_precision<fp32>} : vector<64x56xf32>, vector<56x8xf32>, vector<64x8xf32> -> vector<64x8xf32>
    %41 = vector.shape_cast %40 : vector<64x8xf32> to vector<8x8x8xf32>
    %42 = vector.shape_cast %31 : vector<8x56xf32> to vector<8x1x56xf32>
    %c0_27 = arith.constant 0 : index
    %c0_28 = arith.constant 0 : index
    %43 = vector.load %arg5[%c0_27, %c0_28] : memref<8x56xf32, #tpu.memory_space<vmem>>, vector<8x56xf32>
    %44 = vector.shape_cast %43 : vector<8x56xf32> to vector<1x8x56xf32>
    %45 = vector.broadcast %42 : vector<8x1x56xf32> to vector<8x8x56xf32>
    %46 = vector.broadcast %44 : vector<1x8x56xf32> to vector<8x8x56xf32>
    %47 = arith.mulf %45, %46 : vector<8x8x56xf32>
    %48 = vector.shape_cast %47 : vector<8x8x56xf32> to vector<64x56xf32>
    %c0_29 = arith.constant 0 : index
    %c0_30 = arith.constant 0 : index
    %49 = vector.load %arg2[%c0_29, %c0_30] : memref<56x8xf32, #tpu.memory_space<vmem>>, vector<56x8xf32>
    %cst_31 = arith.constant dense<0.000000e+00> : vector<64x8xf32>
    %50 = tpu.matmul %48, %49, %cst_31 {dimension_numbers = #tpu.dot_dimension_numbers<[1], [0], [0], [1], [0, 0, 1, 1], [], []>, precision = #tpu.contract_precision<fp32>} : vector<64x56xf32>, vector<56x8xf32>, vector<64x8xf32> -> vector<64x8xf32>
    %51 = vector.shape_cast %50 : vector<64x8xf32> to vector<8x8x8xf32>
    %52 = arith.addf %41, %51 : vector<8x8x8xf32>
    %cst_32 = arith.constant 5.000000e-01 : f32
    %53 = vector.broadcast %cst_32 : f32 to vector<8x8x8xf32>
    %54 = arith.mulf %53, %52 : vector<8x8x8xf32>
    %cst_33 = arith.constant dense<0.000000e+00> : vector<8x8xf32>
    %55 = vector.multi_reduction <add>, %41, %cst_33 [2] : vector<8x8x8xf32> to vector<8x8xf32>
    %56 = vector.shape_cast %55 : vector<8x8xf32> to vector<8x8x1xf32>
    %57 = vector.broadcast %56 : vector<8x8x1xf32> to vector<8x8x8xf32>
    %58 = arith.divf %41, %57 : vector<8x8x8xf32>
    "tpu.trace_start"() <{level = 10 : i32, message = "tnm,tmo->tno"}> : () -> ()
    %cst_34 = arith.constant dense<0.000000e+00> : vector<8x8x16xf32>
    %59 = tpu.matmul %58, %7, %cst_34 {dimension_numbers = #tpu.dot_dimension_numbers<[2], [1], [1], [2], [0, 0, 0, 1, 1, 2], [0], [0]>, precision = #tpu.contract_precision<fp32>} : vector<8x8x8xf32>, vector<8x8x16xf32>, vector<8x8x16xf32> -> vector<8x8x16xf32>
    "tpu.trace_stop"() : () -> ()
    %cst_35 = arith.constant 0.000000e+00 : f32
    %60 = vector.broadcast %cst_35 : f32 to vector<8x8x16xf32>
    %61 = arith.maximumf %59, %60 : vector<8x8x16xf32>
    %c0_36 = arith.constant 0 : index
    %c0_37 = arith.constant 0 : index
    %c0_38 = arith.constant 0 : index
    %c0_39 = arith.constant 0 : index
    %62 = vector.load %arg11[%c0_36, %c0_37, %c0_38, %c0_39] : memref<1x8x8x16xf32, #tpu.memory_space<vmem>>, vector<1x8x8x16xf32>
    %63 = vector.shape_cast %62 : vector<1x8x8x16xf32> to vector<8x8x16xf32>
    %64 = vector.shape_cast %61 : vector<8x8x16xf32> to vector<1x8x8x16xf32>
    tpu.vector_store %arg11[%c0_36, %c0_37, %c0_38, %c0_39], %64 {strides = array<i32>} : memref<1x8x8x16xf32, #tpu.memory_space<vmem>>, vector<1x8x8x16xf32>,
    %c0_40 = arith.constant 0 : index
    %c0_41 = arith.constant 0 : index
    %c0_42 = arith.constant 0 : index
    %c0_43 = arith.constant 0 : index
    %65 = vector.load %arg12[%c0_40, %c0_41, %c0_42, %c0_43] : memref<1x8x8x8xf32, #tpu.memory_space<vmem>>, vector<1x8x8x8xf32>
    %66 = vector.shape_cast %65 : vector<1x8x8x8xf32> to vector<8x8x8xf32>
    %67 = vector.shape_cast %41 : vector<8x8x8xf32> to vector<1x8x8x8xf32>
    tpu.vector_store %arg12[%c0_40, %c0_41, %c0_42, %c0_43], %67 {strides = array<i32>} : memref<1x8x8x8xf32, #tpu.memory_space<vmem>>, vector<1x8x8x8xf32>,
    %c0_44 = arith.constant 0 : index
    %c0_45 = arith.constant 0 : index
    %c0_46 = arith.constant 0 : index
    %c0_47 = arith.constant 0 : index
    %68 = vector.load %arg13[%c0_44, %c0_45, %c0_46, %c0_47] : memref<1x8x8x8xf32, #tpu.memory_space<vmem>>, vector<1x8x8x8xf32>
    %69 = vector.shape_cast %68 : vector<1x8x8x8xf32> to vector<8x8x8xf32>
    %70 = vector.shape_cast %54 : vector<8x8x8xf32> to vector<1x8x8x8xf32>
    tpu.vector_store %arg13[%c0_44, %c0_45, %c0_46, %c0_47], %70 {strides = array<i32>} : memref<1x8x8x8xf32, #tpu.memory_space<vmem>>, vector<1x8x8x8xf32>,
    %c0_48 = arith.constant 0 : index
    %c0_49 = arith.constant 0 : index
    %c0_50 = arith.constant 0 : index
    %c0_51 = arith.constant 0 : index
    %71 = vector.load %arg14[%c0_48, %c0_49, %c0_50, %c0_51] : memref<1x8x8x8xf32, #tpu.memory_space<vmem>>, vector<1x8x8x8xf32>
    %72 = vector.shape_cast %71 : vector<1x8x8x8xf32> to vector<8x8x8xf32>
    %73 = vector.shape_cast %58 : vector<8x8x8xf32> to vector<1x8x8x8xf32>
    tpu.vector_store %arg14[%c0_48, %c0_49, %c0_50, %c0_51], %73 {strides = array<i32>} : memref<1x8x8x8xf32, #tpu.memory_space<vmem>>, vector<1x8x8x8xf32>,
    return
  }
  func.func @transform_0(%arg0: i32) -> (i32, i32, i32) {
    %c0_i32 = arith.constant 0 : i32
    %c0_i32_0 = arith.constant 0 : i32
    %c0_i32_1 = arith.constant 0 : i32
    return %arg0, %c0_i32, %c0_i32_0 : i32, i32, i32
  }
  func.func @transform_1(%arg0: i32) -> (i32, i32) {
    %c0_i32 = arith.constant 0 : i32
    %c0_i32_0 = arith.constant 0 : i32
    %c0_i32_1 = arith.constant 0 : i32
    return %c0_i32, %c0_i32_0 : i32, i32
  }
  func.func @transform_2(%arg0: i32) -> (i32, i32) {
    %c0_i32 = arith.constant 0 : i32
    %c0_i32_0 = arith.constant 0 : i32
    %c0_i32_1 = arith.constant 0 : i32
    return %c0_i32, %c0_i32_0 : i32, i32
  }
  func.func @transform_3(%arg0: i32) -> (i32, i32) {
    %c0_i32 = arith.constant 0 : i32
    %c0_i32_0 = arith.constant 0 : i32
    %c0_i32_1 = arith.constant 0 : i32
    return %c0_i32, %c0_i32_0 : i32, i32
  }
  func.func @transform_4(%arg0: i32) -> (i32, i32) {
    %c0_i32 = arith.constant 0 : i32
    %c0_i32_0 = arith.constant 0 : i32
    %c0_i32_1 = arith.constant 0 : i32
    return %c0_i32, %c0_i32_0 : i32, i32
  }
  func.func @transform_5(%arg0: i32) -> (i32, i32) {
    %c0_i32 = arith.constant 0 : i32
    %c0_i32_0 = arith.constant 0 : i32
    %c0_i32_1 = arith.constant 0 : i32
    return %c0_i32, %c0_i32_0 : i32, i32
  }
  func.func @transform_6(%arg0: i32) -> (i32, i32) {
    %c0_i32 = arith.constant 0 : i32
    %c0_i32_0 = arith.constant 0 : i32
    %c0_i32_1 = arith.constant 0 : i32
    return %c0_i32, %c0_i32_0 : i32, i32
  }
  func.func @transform_7(%arg0: i32) -> (i32, i32) {
    %c0_i32 = arith.constant 0 : i32
    %c0_i32_0 = arith.constant 0 : i32
    %c0_i32_1 = arith.constant 0 : i32
    return %c0_i32, %c0_i32_0 : i32, i32
  }
  func.func @transform_8(%arg0: i32) -> (i32, i32) {
    %c0_i32 = arith.constant 0 : i32
    %c0_i32_0 = arith.constant 0 : i32
    %c0_i32_1 = arith.constant 0 : i32
    return %c0_i32, %c0_i32_0 : i32, i32
  }
  func.func @transform_9(%arg0: i32) -> (i32, i32) {
    %c0_i32 = arith.constant 0 : i32
    %c0_i32_0 = arith.constant 0 : i32
    %c0_i32_1 = arith.constant 0 : i32
    return %c0_i32, %c0_i32_0 : i32, i32
  }
  func.func @transform_10(%arg0: i32) -> (i32, i32, i32, i32) {
    %c0_i32 = arith.constant 0 : i32
    %c0_i32_0 = arith.constant 0 : i32
    %c0_i32_1 = arith.constant 0 : i32
    %c0_i32_2 = arith.constant 0 : i32
    return %arg0, %c0_i32, %c0_i32_0, %c0_i32_1 : i32, i32, i32, i32
  }
  func.func @transform_11(%arg0: i32) -> (i32, i32, i32, i32) {
    %c0_i32 = arith.constant 0 : i32
    %c0_i32_0 = arith.constant 0 : i32
    %c0_i32_1 = arith.constant 0 : i32
    %c0_i32_2 = arith.constant 0 : i32
    return %arg0, %c0_i32, %c0_i32_0, %c0_i32_1 : i32, i32, i32, i32
  }
  func.func @transform_12(%arg0: i32) -> (i32, i32, i32, i32) {
    %c0_i32 = arith.constant 0 : i32
    %c0_i32_0 = arith.constant 0 : i32
    %c0_i32_1 = arith.constant 0 : i32
    %c0_i32_2 = arith.constant 0 : i32
    return %arg0, %c0_i32, %c0_i32_0, %c0_i32_1 : i32, i32, i32, i32
  }
  func.func @transform_13(%arg0: i32) -> (i32, i32, i32, i32) {
    %c0_i32 = arith.constant 0 : i32
    %c0_i32_0 = arith.constant 0 : i32
    %c0_i32_1 = arith.constant 0 : i32
    %c0_i32_2 = arith.constant 0 : i32
    return %arg0, %c0_i32, %c0_i32_0, %c0_i32_1 : i32, i32, i32, i32
  }
}

</mosaic_0001>

<bundles_post_ra>
// kernel: tpu_custom_call.1
= control target key start
LH: loop header
LB: loop body
LE: loop exit
PB: predicated region body
PF: predicated region fallthrough
CT: control target
= control target key end

     0   :  { %s11558_s0 = inlined_call_operand.vmem [shape: f32[2,64,32], index: 0, kind: input, shape index: {}]   ;;  %s11559_s1 = inlined_call_operand.vmem [shape: f32[56,8], index: 1, kind: input, shape index: {}]   ;;  %s11560_s2 = inlined_call_operand.vmem [shape: f32[56,8], index: 2, kind: input, shape index: {}]   ;;  %s11561_s3 = inlined_call_operand.vmem [shape: f32[8,56], index: 3, kind: input, shape index: {}]   ;;  %s11562_s4 = inlined_call_operand.vmem [shape: f32[8,56], index: 4, kind: input, shape index: {}]   ;;  %s11563_s5 = inlined_call_operand.vmem [shape: f32[32,16], index: 5, kind: input, shape index: {}]   ;;  %s11564_s6 = inlined_call_operand.vmem [shape: f32[1,16], index: 6, kind: input, shape index: {}]   ;;  %s11565_s7 = inlined_call_operand.vmem [shape: f32[1,16], index: 7, kind: input, shape index: {}]   ;;  %s11566_s8 = inlined_call_operand.vmem [shape: f32[1,16], index: 8, kind: input, shape index: {}]   ;;  %s11567_s9 = inlined_call_operand.<no memory space> [shape: f32[1,1], index: 9, kind: input, shape index: {}]   ;;  %s11568_s10 = inlined_call_operand.hbm [shape: f32[2,8,8,16], index: 10, kind: output, shape index: {0}]   ;;  %s11569_s11 = inlined_call_operand.hbm [shape: f32[2,8,8,8], index: 11, kind: output, shape index: {1}]   ;;  %s11570_s12 = inlined_call_operand.hbm [shape: f32[2,8,8,8], index: 12, kind: output, shape index: {2}]   ;;  %s11571_s13 = inlined_call_operand.hbm [shape: f32[2,8,8,8], index: 13, kind: output, shape index: {3}]  }
   0x1   :  { %11617 = sst [smem:[#allocation29_spill]] %s11558_s0  ;;  %v19_v0 = vstv %s11567_s9 }
   0x2   :  { %11618 = sst [smem:[#allocation30_spill]] %s11559_s1  ;;  %20 = vst [vmem:[#allocation2] sm:$0x1] %v19_v0 }
   0x3   :  { %11619 = sst [smem:[#allocation31_spill]] %s11560_s2 }
   0x4   :  { %11620 = sst [smem:[#allocation32_spill]] %s11561_s3 }
   0x5   :  { %11621 = sst [smem:[#allocation33_spill]] %s11562_s4 }
   0x6   :  { %11622 = sst [smem:[#allocation34_spill]] %s11563_s5 }
   0x7   :  { %11623 = sst [smem:[#allocation35_spill]] %s11564_s6 }
   0x8   :  { %21 = vsyncpa [#allocation4], 0 }
   0x9   :  { %23 = vsyncpa [#allocation4 + $0x1], 0 }
   0xa   :  { %24 = vsyncpa [#allocation6], 0 }
   0xb   :  { %26 = vsyncpa [#allocation6 + $0x1], 0 }
   0xc   :  { %27 = vsyncpa [#allocation9], 0 }
   0xd   :  { %29 = vsyncpa [#allocation9 + $0x1], 0  ;;  %s9990_s27 = smov 0   ;;  %s9992_s28 = smov 0  }
   0xe   :  { %s9994_s29 = smov 0   ;;  %s9996_s30 = smov 0  }
   0xf LB: > { %s10011_s9 = sadd.s32 4294967295, %s9905_s30   ;;  %s11572_s14 = sadd.s32 4294967294, %s9905_s30   ;;  %s9905_s30 = sphi %s9996_s30, %s11687_s30   ;;  %s9901_s29 = sphi %s9994_s29, %s11686_s29   ;;  %s9897_s28 = sphi %s9992_s28, %s11685_s28   ;;  %s9893_s27 = sphi %s9990_s27, %s11684_s27  }
  0x10   : > { %s10015_s15 = sadd.s32 1, %s9905_s30   ;;  %s257_s16 = sadd.s32 1, %s9901_s29 }
  0x11   : > { %s254_s17 = ssub.s32 %s9905_s30, %s10015_s15  ;;  %p267_p0 = scmp.ne.s32.totalorder %s9901_s29, %s9897_s28 }
  0x12   : > { %p255_p1 = scmp.eq.s32.totalorder %s254_s17, 0  ;;  %p268_p2 = scmp.eq.s32.totalorder %s10011_s9, 1 }
  0x13   : > { %p273_p3 = scmp.ne.s32.totalorder %s9897_s28, %s9893_s27  ;;  %p274_p4 = scmp.eq.s32.totalorder %s11572_s14, 1 }
  0x14   : > { %s10028_s18 = scalar_select %p255_p1, %s9901_s29, %s257_s16  }
  0x15   : > { %p10030_p5 = por %p268_p2, %p267_p0  ;;  %p10034_p6 = por %p274_p4, %p273_p3 }
  0x16   : > { %p8138_p7 = scmp.ge.s32.totalorder %s9905_s30, 1  ;;  %p405_p8 = scmp.lt.s32.totalorder %s9905_s30, 3 }
  0x18   : > { %p406_p9 = pnand %p8138_p7, %p405_p8 }
  0x1a   : > { %409 = sbr.rel (%p406_p9) target bundleno = 1738 (0x6ca), region = 60 }
  0x21   : > { %s11626_s5 = sld [smem:[#allocation34_spill]]  ;;  %p464_p10 = scmp.lt.s32.totalorder %s10011_s9, 1  ;;  %vm488_vm0 = vcmask 261120   ;;  %vm1314_vm1 = vcmask 130048   ;;  %vm9908_vm2 = vmmov 0   ;;  %vm1422_vm3 = vcmask 1041409  }
  0x22   : > { %s11627_s0 = sld [smem:[#allocation29_spill]]  ;;  %s11628_s6 = sld [smem:[#allocation35_spill]]  ;;  %vm1424_vm4 = vcmask 1042434   ;;  %vm1426_vm5 = vcmask 1043459   ;;  %vm1428_vm6 = vcmask 1044484   ;;  %vm1430_vm7 = vcmask 1045509  }
  0x23   : > { %s465_s21 = scalar_select %p464_p10, %s10011_s9, 1  ;;  %vm1432_vm8 = vcmask 1046534   ;;  %vm1434_vm9 = vcmask 1047559   ;;  %vm1436_vm10 = vcmask 64512   ;;  %vm2501_vm12 = vcmask 457728  }
  0x24   : > { %s11637_s4 = sld [smem:[#allocation33_spill]]  ;;  %s11638_s3 = sld [smem:[#allocation32_spill]] }
  0x25   : > { %s8163_s22 = sshll.u32 %s465_s21, 6  ;;  %s11639_s2 = sld [smem:[#allocation31_spill]] }
  0x26   : > { %s11640_s1 = sld [smem:[#allocation30_spill]]  ;;  %s10993_s14 = sand.u32 1, %s9897_s28  }
  0x27   : > { %v477_v1 = vld [vmem:[%s11626_s5] sm:$0xff]  ;;  %v478_v2 = vld [vmem:[%s11626_s5 + $0x8] sm:$0xff]  ;;  %v479_v3 = vld [vmem:[%s11626_s5 + $0x10] sm:$0xff]  ;;  %s10996_s16 = sshll.u32 %s10993_s14, 6  ;;  %s11386_s26 = sshll.u32 %s10011_s9, 10 }
  0x28   : > { %v514_v4 = vand.u32 4294901760, %v477_v1  ;;  %v517_v5 = vand.u32 4294901760, %v478_v2  ;;  %v480_v6 = vld [vmem:[%s11626_s5 + $0x18] sm:$0xff]  ;;  %v520_v7 = vand.u32 4294901760, %v479_v3  ;;  %s10070_s25 = scalar_lea.vmem %s11627_s0, %s8163_s22  ;;  %s11001_s17 = scalar_lea.vmem [#allocation5], %s10996_s16 }
  0x29   : > { %v523_v8 = vand.u32 4294901760, %v480_v6  ;;  %v469_v17 = vld [vmem:[%s10070_s25] sm:$0xff]  ;;  %v470_v18 = vld [vmem:[%s10070_s25 + $0x8] sm:$0xff]  ;;  %v471_v19 = vld [vmem:[%s10070_s25 + $0x10] sm:$0xff]  ;;  %s11023_s21 = scalar_lea.vmem [#allocation7], %s10996_s16  ;;  %s11091_s22 = scalar_lea.vmem [#allocation8], %s10996_s16 }
  0x2a   : > { %v10054_v9 = vpack.c.bf16 %v517_v5, %v514_v4  ;;  %v10056_v10 = vsub.f32 %v477_v1, %v514_v4  ;;  %v10058_v11 = vsub.f32 %v478_v2, %v517_v5  ;;  %v10060_v12 = vsub.f32 %v479_v3, %v520_v7  ;;  %v472_v26 = vld [vmem:[%s10070_s25 + $0x18] sm:$0xff]  ;;  %v473_v27 = vld [vmem:[%s10070_s25 + $0x20] sm:$0xff]  ;;  %v474_v40 = vld [vmem:[%s10070_s25 + $0x28] sm:$0xff]  ;;  %s11375_s23 = scalar_lea.vmem [#allocation3], %s10996_s16  ;;  %s7964_s24 = sshll.u32 %s11023_s21, 4  ;;  %s11395_s24 = int_to_ptr.vmem [resolvable:$true] %s7964_s24 }
  0x2b   : > { %v10062_v13 = vpack.c.bf16 %v523_v8, %v520_v7  ;;  %v10064_v14 = vsub.f32 %v480_v6, %v523_v8  ;;  %v490_v22 = vsel %vm488_vm0, %v469_v17, 0  ;;  %v493_v25 = vsel %vm488_vm0, %v470_v18, 0  ;;  %v475_v49 = vld [vmem:[%s10070_s25 + $0x30] sm:$0xff]  ;;  %v476_v62 = vld [vmem:[%s10070_s25 + $0x38] sm:$0xff]  ;;  %s7908_s25 = sand.u32 1, %s10011_s9   ;;  %s9911_s0 = smov [#allocation5]  }
  0x2c   : > { %9273 = vmatprep.subr.bf16.mxu0 %v10054_v9  ;;  %v665_v15 = vand.u32 4294901760, %v10056_v10  ;;  %v672_v16 = vand.u32 4294901760, %v10058_v11  ;;  %v679_v20 = vand.u32 4294901760, %v10060_v12  ;;  %v10091_v28 = vand.u32 4294901760, %v490_v22  ;;  %s11401_s9 = scalar_lea.sflag [#allocation6], %s7908_s25  ;;  %s9755_s16 = sshll.u32 %s9911_s0, 4  ;;  %s9756_s16 = int_to_ptr.vmem [resolvable:$false] %s9755_s16 }
  0x2d   : > { %9275 = vmatpush3.bf16.msra.mxu0 %v10054_v9  ;;  %v686_v21 = vand.u32 4294901760, %v10064_v14  ;;  %v10093_v29 = vand.u32 4294901760, %v493_v25  ;;  %v496_v30 = vsel %vm488_vm0, %v471_v19, 0  ;;  %v499_v31 = vsel %vm488_vm0, %v472_v26, 0 }
  0x2e   : > { %9277 = vmatprep.subr.bf16.mxu0 %v10062_v13  ;;  %v666_v23 = vsub.f32 %v10056_v10, %v665_v15  ;;  %v673_v24 = vsub.f32 %v10058_v11, %v672_v16  ;;  %v10097_v34 = vand.u32 4294901760, %v496_v30  ;;  %v10099_v35 = vand.u32 4294901760, %v499_v31 }
  0x2f   : > { %v10103_v36 = vsub.f32 %v490_v22, %v10091_v28  ;;  %v10106_v37 = vsub.f32 %v493_v25, %v10093_v29  ;;  %v502_v38 = vsel %vm488_vm0, %v473_v27, 0  ;;  %v680_v39 = vsub.f32 %v10060_v12, %v679_v20 }
  0x30   : > { %v667_v32 = vand.u32 4294901760, %v666_v23  ;;  %v674_v33 = vand.u32 4294901760, %v673_v24  ;;  %v10114_v42 = vsub.f32 %v496_v30, %v10097_v34  ;;  %v10117_v43 = vsub.f32 %v499_v31, %v10099_v35 }
  0x31   : > { %9279 = vmatpush3.bf16.msra.mxu0 %v10062_v13  ;;  %v10119_v44 = vand.u32 4294901760, %v502_v38  ;;  %v584_v45 = vand.u32 4294901760, %v10103_v36  ;;  %v594_v46 = vand.u32 4294901760, %v10106_v37  ;;  %v681_v47 = vand.u32 4294901760, %v680_v39 }
  0x32   : > { %v9280_v41 = vpack.c.bf16 %v674_v33, %v667_v32  ;;  %v687_v48 = vsub.f32 %v10064_v14, %v686_v21  ;;  %v604_v50 = vand.u32 4294901760, %v10114_v42  ;;  %v614_v51 = vand.u32 4294901760, %v10117_v43 }
  0x33   : > { %v10130_v52 = vsub.f32 %v502_v38, %v10119_v44  ;;  %v505_v53 = vsel %vm488_vm0, %v474_v40, 0  ;;  %v585_v54 = vsub.f32 %v10103_v36, %v584_v45  ;;  %v595_v55 = vsub.f32 %v10106_v37, %v594_v46 }
  0x34   : > { %9281 = vmatprep.subr.bf16.mxu0 %v9280_v41  ;;  %v688_v56 = vand.u32 4294901760, %v687_v48  ;;  %v10139_v57 = vand.u32 4294901760, %v505_v53  ;;  %v605_v58 = vsub.f32 %v10114_v42, %v604_v50  ;;  %v615_v59 = vsub.f32 %v10117_v43, %v614_v51 }
  0x35   : > { %v624_v60 = vand.u32 4294901760, %v10130_v52  ;;  %v508_v61 = vsel %vm488_vm0, %v475_v49, 0  ;;  %v586_v63 = vand.u32 4294901760, %v585_v54  ;;  %v596_v0 = vand.u32 4294901760, %v595_v55  ;;  %v8146_v54 = vld [vmem:[%s11565_s7] ss:$0 sm:$0xff] }
  0x36   : > { %v10151_v1 = vsub.f32 %v505_v53, %v10139_v57  ;;  %v606_v2 = vand.u32 4294901760, %v605_v58  ;;  %v9284_v4 = vpack.c.bf16 %v688_v56, %v681_v47  ;;  %v10156_v5 = vand.u32 4294901760, %v508_v61 }
  0x37   : > { %v625_v3 = vsub.f32 %v10130_v52, %v624_v60  ;;  %8548 = vmatprep.mubr.f32.mxu0 %v586_v63  ;;  %v511_v7 = vsel %vm488_vm0, %v476_v62, 0  ;;  %v616_v8 = vand.u32 4294901760, %v615_v59  ;;  %v9288_v25 = vpack.c.bf16 %v10058_v11, %v10056_v10 }
  0x38   : > { %v634_v6 = vand.u32 4294901760, %v10151_v1  ;;  %8549 = vmatmul.mubr.f32.vlgmr.msra.gmra.mrb[0].mxu0 %v596_v0  ;;  %v643_v17 = vsub.f32 %v508_v61, %v10156_v5  ;;  %v10161_v18 = vand.u32 4294901760, %v511_v7  ;;  %v9292_v38 = vpack.c.bf16 %v10064_v14, %v10060_v12  ;;  %v8147_v12 = vld [vmem:[%s11566_s8] ss:$0 sm:$0xff] }
  0x39   : > { %9283 = vmatpush3.bf16.msra.mxu0 %v9280_v41  ;;  %8551 = vmatprep.mubr.f32.mxu0 %v606_v2  ;;  %v626_v19 = vand.u32 4294901760, %v625_v3  ;;  %v9304_v39 = vpack.c.bf16 %v672_v16, %v665_v15  ;;  %v9308_v10 = vpack.c.bf16 %v686_v21, %v679_v20 }
  0x3a   : > { %v635_v22 = vsub.f32 %v10151_v1, %v634_v6  ;;  %9285 = vmatprep.subr.bf16.mxu0 %v9284_v4  ;;  %v644_v23 = vand.u32 4294901760, %v643_v17  ;;  %v653_v24 = vsub.f32 %v511_v7, %v10161_v18 }
  0x3c   : > { %8552 = vmatmul.mubr.f32.gmra.mrb[2].mxu0 %v616_v8  ;;  %v636_v26 = vand.u32 4294901760, %v635_v22  ;;  %v645_v27 = vsub.f32 %v643_v17, %v644_v23  ;;  %v654_v30 = vand.u32 4294901760, %v653_v24  ;;  %v10285_v22 = vld [vmem:[%s11637_s4] sm:$0xff] }
  0x3d   : > { %8554 = vmatprep.mubr.f32.mxu0 %v626_v19  ;;  %9287 = vmatpush3.bf16.msra.mxu0 %v9284_v4 }
  0x3e   : > { %v646_v31 = vand.u32 4294901760, %v645_v27  ;;  %v655_v32 = vsub.f32 %v653_v24, %v654_v30  ;;  %9289 = vmatprep.subr.bf16.mxu0 %v9288_v25  ;;  %v1388_v27 = vlaneseq }
  0x40   : > { %8555 = vmatmul.mubr.f32.gmra.mrb[4].mxu0 %v636_v26  ;;  %v656_v33 = vand.u32 4294901760, %v655_v32  ;;  %v9909_v26 = vmov 0  }
  0x41   : > { %8557 = vmatprep.mubr.f32.mxu0 %v646_v31  ;;  %9732 = vset.pattern.permute.xlu0 %v9909_v26  ;;  %v10295_v31 = vshrl.u32 %v1388_v27, 7 }
  0x44   : > { %8558 = vmatmul.mubr.f32.gmra.mrb[6].mxu0 %v656_v33 }
  0x45   : > { %8568 = vmatprep.mubr.f32.mxu0 %v10091_v28 }
  0x48   : > { %8569 = vmatmul.mubr.f32.vlgmr.msra.gmra.mrb[0].mxu0 %v10093_v29 }
  0x49   : > { %9291 = vmatpush3.bf16.msra.mxu0 %v9288_v25  ;;  %8571 = vmatprep.mubr.f32.mxu0 %v10097_v34  ;;  %v8148_v25 = vld [vmem:[#allocation2] ss:$0 sm:$0xff] }
  0x4a   : > { %9293 = vmatprep.subr.bf16.mxu0 %v9292_v38 }
  0x4c   : > { %8572 = vmatmul.mubr.f32.gmra.mrb[2].mxu0 %v10099_v35 }
  0x4d   : > { %8574 = vmatprep.mubr.f32.mxu0 %v10119_v44  ;;  %9295 = vmatpush3.bf16.msra.mxu0 %v9292_v38 }
  0x4e   : > { %9297 = vmatprep.subr.bf16.mxu0 %v10054_v9 }
  0x50   : > { %8575 = vmatmul.mubr.f32.gmra.mrb[4].mxu0 %v10139_v57 }
  0x51   : > { %8577 = vmatprep.mubr.f32.mxu0 %v10156_v5 }
  0x54   : > { %8578 = vmatmul.mubr.f32.gmra.mrb[6].mxu0 %v10161_v18 }
  0x55   : > { %8588 = vmatprep.mubr.f32.mxu0 %v10103_v36 }
  0x58   : > { %8589 = vmatmul.mubr.f32.vlgmr.msra.gmra.mrb[0].mxu0 %v10106_v37 }
  0x59   : > { %9299 = vmatpush3.bf16.msra.mxu0 %v10054_v9  ;;  %8591 = vmatprep.mubr.f32.mxu0 %v10114_v42 }
  0x5a   : > { %9301 = vmatprep.subr.bf16.mxu0 %v10062_v13 }
  0x5c   : > { %8592 = vmatmul.mubr.f32.gmra.mrb[2].mxu0 %v10117_v43 }
  0x5d   : > { %8594 = vmatprep.mubr.f32.mxu0 %v10130_v52  ;;  %9303 = vmatpush3.bf16.msra.mxu0 %v10062_v13 }
  0x5e   : > { %9305 = vmatprep.subr.bf16.mxu0 %v9304_v39 }
  0x60   : > { %8595 = vmatmul.mubr.f32.gmra.mrb[4].mxu0 %v10151_v1 }
  0x61   : > { %8597 = vmatprep.mubr.f32.mxu0 %v643_v17 }
  0x64   : > { %8598 = vmatmul.mubr.f32.gmra.mrb[6].mxu0 %v653_v24  ;;  %v11573_v24 = vmov 0.0  }
  0x65   : > { %8608 = vmatprep.mubr.f32.mxu0 %v584_v45  ;;  %8660 = vmatprep.subr.mxu1 %v11573_v24 }
  0x66   : > { %8662 = vmatprep.mubr.msk.f32.mxu1 %vm9908_vm2, %v11573_v24 }
  0x68   : > { %8609 = vmatmul.mubr.f32.vlgmr.msra.gmra.mrb[0].mxu0 %v594_v46 }
  0x69   : > { %9307 = vmatpush3.bf16.msra.mxu0 %v9304_v39  ;;  %8611 = vmatprep.mubr.f32.mxu0 %v604_v50 }
  0x6a   : > { %9309 = vmatprep.subr.bf16.mxu0 %v9308_v10 }
  0x6c   : > { %8612 = vmatmul.mubr.f32.gmra.mrb[2].mxu0 %v614_v51 }
  0x6d   : > { %8614 = vmatprep.mubr.f32.mxu0 %v624_v60  ;;  %9311 = vmatpush3.bf16.msra.mxu0 %v9308_v10 }
  0x6e   : > { %9313 = vmatprep.subr.bf16.mxu0 %v10054_v9 }
  0x70   : > { %8615 = vmatmul.mubr.f32.gmra.mrb[4].mxu0 %v634_v6 }
  0x71   : > { %8617 = vmatprep.mubr.f32.mxu0 %v644_v23  ;;  %v10288_v23 = vand.u32 4294901760, %v10285_v22 }
  0x73   : > { %8661 = vmatpush3.msra.mxu1 %v10288_v23 }
  0x74   : > { %8618 = vmatmul.mubr.f32.gmra.mrb[6].mxu0 %v654_v30  ;;  %8665 = vmatprep.subr.mxu1 %v11573_v24  ;;  %v1389_v30 = vand.u32 127, %v1388_v27 }
  0x75   : > { %8628 = vmatprep.mubr.f32.mxu0 %v10091_v28 }
  0x76   : > { %v10298_v33 = vsub.s32 %v1389_v30, %v10295_v31 }
  0x78   : > { %8629 = vmatmul.mubr.f32.vlgmr.msra.gmra.mrb[0].mxu0 %v10093_v29 }
  0x79   : > { %9315 = vmatpush3.bf16.msra.mxu0 %v10054_v9  ;;  %8631 = vmatprep.mubr.f32.mxu0 %v10097_v34  ;;  %v8145_v9 = vld [vmem:[%s11628_s6] ss:$0 sm:$0xff] }
  0x7a   : > { %9317 = vmatprep.subr.bf16.mxu0 %v10062_v13 }
  0x7c   : > { %8632 = vmatmul.mubr.f32.gmra.mrb[2].mxu0 %v10099_v35 }
  0x7d   : > { %8634 = vmatprep.mubr.f32.mxu0 %v10119_v44  ;;  %9319 = vmatpush3.bf16.msra.mxu0 %v10062_v13 }
  0x80   : > { %8635 = vmatmul.mubr.f32.gmra.mrb[4].mxu0 %v10139_v57 }
  0x81   : > { %8637 = vmatprep.mubr.f32.mxu0 %v10156_v5 }
  0x84   : > { %8638 = vmatmul.mubr.f32.gmra.mrb[6].mxu0 %v10161_v18 }
  0x85   : > { %8648 = vmatprep.mubr.f32.mxu0 %v10091_v28 }
  0x88   : > { %8649 = vmatmul.mubr.f32.vlgmr.msra.gmra.mrb[0].mxu0 %v10093_v29 }
  0x89   : > { %8651 = vmatprep.mubr.f32.mxu0 %v10097_v34 }
  0x8c   : > { %8652 = vmatmul.mubr.f32.gmra.mrb[2].mxu0 %v10099_v35 }
  0x8d   : > { %8654 = vmatprep.mubr.f32.mxu0 %v10119_v44 }
  0x90   : > { %8655 = vmatmul.mubr.f32.gmra.mrb[4].mxu0 %v10139_v57 }
  0x91   : > { %8657 = vmatprep.mubr.f32.mxu0 %v10156_v5 }
  0x94   : > { %8658 = vmatmul.mubr.f32.gmra.mrb[6].mxu0 %v10161_v18 }
 0x15b   : > { %v8650_v11 = vpop.f32.mrb[0].mxu0 }
 0x15c   : > { %v10231_v13 = vadd.f32 %v8650_v11, %v8145_v9  ;;  %v1253_v14 = vpop.f32.mrb[1].mxu0 }
 0x15d   : > { %v10233_v15 = vadd.f32 %v8145_v9, %v1253_v14 }
 0x15e   : > { %11629 = vst [vmem:[#allocation13_spill] sm:$0xff] %v10231_v13  ;;  %v1347_v16 = vmul.f32 %v10231_v13, %v8147_v12  ;;  %v1307_v61 = vmul.f32 %v10231_v13, %v8146_v54 }
 0x15f   : > { %11630 = vst [vmem:[#allocation14_spill] sm:$0xff] %v10233_v15  ;;  %v8653_v20 = vpop.f32.mrb[2].mxu0  ;;  %v1346_v34 = vmul.f32 %v10233_v15, %v8147_v12  ;;  %v1306_v59 = vmul.f32 %v10233_v15, %v8146_v54 }
 0x160   : > { %v10236_v21 = vadd.f32 %v8653_v20, %v8145_v9  ;;  %v1265_v28 = vpop.f32.mrb[3].mxu0  ;;  %v1357_v29 = vsel %vm1314_vm1, %v1347_v16, 0.0  ;;  %v1318_v0 = vsel %vm1314_vm1, %v1307_v61, 0.0 }
 0x161   : > { %v10240_v35 = vadd.f32 %v8145_v9, %v1265_v28  ;;  %1358 = vadd.xlane.f32.xlu0 %v1357_v29  ;;  %v1354_v43 = vsel %vm1314_vm1, %v1346_v34, 0.0  ;;  %v1315_v62 = vsel %vm1314_vm1, %v1306_v59, 0.0 }
 0x162   : > { %11631 = vst [vmem:[#allocation15_spill] sm:$0xff] %v10236_v21  ;;  %v1349_v36 = vmul.f32 %v10236_v21, %v8147_v12  ;;  %v1309_v1 = vmul.f32 %v10236_v21, %v8146_v54 }
 0x163   : > { %11632 = vst [vmem:[#allocation16_spill] sm:$0xff] %v10240_v35  ;;  %v8656_v37 = vpop.f32.mrb[4].mxu0  ;;  %v1348_v44 = vmul.f32 %v10240_v35, %v8147_v12  ;;  %v1308_v63 = vmul.f32 %v10240_v35, %v8146_v54 }
 0x164   : > { %v10243_v40 = vadd.f32 %v8656_v37, %v8145_v9  ;;  %v1277_v41 = vpop.f32.mrb[5].mxu0  ;;  %v1363_v42 = vsel %vm1314_vm1, %v1349_v36, 0.0  ;;  %v1324_v4 = vsel %vm1314_vm1, %v1309_v1, 0.0 }
 0x165   : > { %v10248_v45 = vadd.f32 %v8145_v9, %v1277_v41  ;;  %1364 = vadd.xlane.f32.xlu1 %v1363_v42  ;;  %1355 = vadd.xlane.f32.xlu0 %v1354_v43  ;;  %v1360_v50 = vsel %vm1314_vm1, %v1348_v44, 0.0  ;;  %v1321_v2 = vsel %vm1314_vm1, %v1308_v63, 0.0 }
 0x166   : > { %11633 = vst [vmem:[#allocation17_spill] sm:$0xff] %v10243_v40  ;;  %v1351_v51 = vmul.f32 %v10243_v40, %v8147_v12  ;;  %v1311_v5 = vmul.f32 %v10243_v40, %v8146_v54 }
 0x167   : > { %11634 = vst [vmem:[#allocation18_spill] sm:$0xff] %v10248_v45  ;;  %v8659_v46 = vpop.f32.mrb[6].mxu0  ;;  %v1350_v47 = vmul.f32 %v10248_v45, %v8147_v12  ;;  %v1310_v3 = vmul.f32 %v10248_v45, %v8146_v54 }
 0x168   : > { %v10251_v48 = vadd.f32 %v8659_v46, %v8145_v9  ;;  %v1289_v49 = vpop.f32.mrb[7].mxu0  ;;  %v1369_v56 = vsel %vm1314_vm1, %v1351_v51, 0.0  ;;  %v1330_v8 = vsel %vm1314_vm1, %v1311_v5, 0.0 }
 0x169   : > { %v10255_v52 = vadd.f32 %v8145_v9, %v1289_v49  ;;  %1361 = vadd.xlane.f32.xlu1 %v1360_v50  ;;  %v1366_v53 = vsel %vm1314_vm1, %v1350_v47, 0.0  ;;  %v1327_v6 = vsel %vm1314_vm1, %v1310_v3, 0.0  ;;  %v1517_v47 = vsub.f32 %v10285_v22, %v10288_v23 }
 0x16a   : > { %11635 = vst [vmem:[#allocation19_spill] sm:$0xff] %v10251_v48  ;;  %1367 = vadd.xlane.f32.xlu0 %v1366_v53  ;;  %v1353_v57 = vmul.f32 %v10251_v48, %v8147_v12  ;;  %v1313_v17 = vmul.f32 %v10251_v48, %v8146_v54 }
 0x16b   : > { %11636 = vst [vmem:[#allocation20_spill] sm:$0xff] %v10255_v52  ;;  %v1352_v55 = vmul.f32 %v10255_v52, %v8147_v12  ;;  %v1312_v7 = vmul.f32 %v10255_v52, %v8146_v54 }
 0x16c   : > { %v1375_v60 = vsel %vm1314_vm1, %v1353_v57, 0.0  ;;  %v1336_v19 = vsel %vm1314_vm1, %v1313_v17, 0.0 }
 0x16d   : > { %1370 = vadd.xlane.f32.xlu1 %v1369_v56  ;;  %v1372_v58 = vsel %vm1314_vm1, %v1352_v55, 0.0  ;;  %v1333_v18 = vsel %vm1314_vm1, %v1312_v7, 0.0  ;;  %v1518_v56 = vand.u32 4294901760, %v1517_v47 }
 0x16e   : > { %1373 = vadd.xlane.f32.xlu0 %v1372_v58 }
 0x16f   : > { %v1519_v1 = vsub.f32 %v1517_v47, %v1518_v56 }
 0x171   : > { %1376 = vadd.xlane.f32.xlu1 %v1375_v60 }
 0x172   : > { %1316 = vadd.xlane.f32.xlu0 %v1315_v62 }
 0x175   : > { %1319 = vadd.xlane.f32.xlu1 %v1318_v0 }
 0x176   : > { %1322 = vadd.xlane.f32.xlu0 %v1321_v2 }
 0x179   : > { %1325 = vadd.xlane.f32.xlu1 %v1324_v4 }
 0x17a   : > { %1328 = vadd.xlane.f32.xlu0 %v1327_v6 }
 0x17d   : > { %1331 = vadd.xlane.f32.xlu1 %v1330_v8 }
 0x17e   : > { %1334 = vadd.xlane.f32.xlu0 %v1333_v18  ;;  %v1520_v18 = vand.u32 4294901760, %v1519_v1  ;;  %v10426_v1 = vld [vmem:[%s11640_s1 + $0x28] sm:$0xff] }
 0x181   : > { %1337 = vadd.xlane.f32.xlu1 %v1336_v19 }
 0x194   : > { %2387 = vperm.xlu0 %9732, %v8148_v25  }
 0x1ee   : > { %v1359_v32 = vpop.xlane.xlu0 %1358 }
 0x1ef   : > { %v1397_v9 = vrot.slane %v1359_v32, %v10298_v33 }
 0x1f2   : > { %v1365_v38 = vpop.xlane.xlu1 %1364  ;;  %v1356_v39 = vpop.xlane.xlu0 %1355 }
 0x1f3   : > { %v1393_v10 = vrot.slane %v1356_v39, %v10298_v33  ;;  %v1405_v16 = vrot.slane %v1365_v38, %v10298_v33 }
 0x1f5   : > { %v1423_v20 = vsel %vm1422_vm3, %v1397_v9, %v1393_v10  ;;  %v10337_v10 = vld [vmem:[%s11638_s3] sm:$0xff] }
 0x1f6   : > { %v1362_v11 = vpop.xlane.xlu1 %1361 }
 0x1f7   : > { %v1401_v12 = vrot.slane %v1362_v11, %v10298_v33  ;;  %v1368_v14 = vpop.xlane.xlu0 %1367 }
 0x1f8   : > { %v1409_v28 = vrot.slane %v1368_v14, %v10298_v33 }
 0x1f9   : > { %v1425_v29 = vsel %vm1424_vm4, %v1401_v12, %v1423_v20 }
 0x1fa   : > { %v1427_v34 = vsel %vm1426_vm5, %v1405_v16, %v1425_v29  ;;  %v1371_v36 = vpop.xlane.xlu1 %1370 }
 0x1fb   : > { %v1429_v37 = vsel %vm1428_vm6, %v1409_v28, %v1427_v34  ;;  %v1413_v41 = vrot.slane %v1371_v36, %v10298_v33  ;;  %v1374_v42 = vpop.xlane.xlu0 %1373 }
 0x1fc   : > { %v1417_v43 = vrot.slane %v1374_v42, %v10298_v33  ;;  %v2495_v42 = vld [vmem:[%s11639_s2 + $0x8] sm:$0xff] }
 0x1fd   : > { %v1431_v44 = vsel %vm1430_vm7, %v1413_v41, %v1429_v37 }
 0x1fe   : > { %v1377_v46 = vpop.xlane.xlu1 %1376  ;;  %v1433_v51 = vsel %vm1432_vm8, %v1417_v43, %v1431_v44  ;;  %v3359_v43 = vld [vmem:[%s11640_s1] sm:$0xff] }
 0x1ff   : > { %v1421_v49 = vrot.slane %v1377_v46, %v10298_v33  ;;  %v1317_v50 = vpop.xlane.xlu0 %1316  ;;  %v2530_v46 = vand.u32 4294901760, %v2495_v42 }
 0x200   : > { %v1896_v58 = vrot.slane %v1317_v50, %v10298_v33  ;;  %v2496_v50 = vld [vmem:[%s11639_s2 + $0x10] sm:$0xff] }
 0x201   : > { %v1435_v53 = vsel %vm1434_vm9, %v1421_v49, %v1433_v51  ;;  %v3391_v49 = vand.u32 4294901760, %v3359_v43  ;;  %v2497_v51 = vld [vmem:[%s11639_s2 + $0x18] sm:$0xff] }
 0x202   : > { %v1437_v54 = vsel %vm1436_vm10, %v1435_v53, 0  ;;  %v1320_v55 = vpop.xlane.xlu1 %1319 }
 0x203   : > { %v1505_v57 = vand.u32 4294901760, %v1437_v54  ;;  %v1900_v59 = vrot.slane %v1320_v55, %v10298_v33  ;;  %v1323_v60 = vpop.xlane.xlu0 %1322  ;;  %v2536_v55 = vand.u32 4294901760, %v2497_v51 }
 0x204   : > { %v1904_v61 = vrot.slane %v1323_v60, %v10298_v33 }
 0x205   : > { %v1506_v62 = vsub.f32 %v1437_v54, %v1505_v57  ;;  %v1925_v63 = vsel %vm1422_vm3, %v1900_v59, %v1896_v58  ;;  %v2533_v54 = vand.u32 4294901760, %v2496_v50  ;;  %v10406_v58 = vld [vmem:[%s11639_s2 + $0x20] sm:$0xff] }
 0x206   : > { %v1326_v0 = vpop.xlane.xlu1 %1325  ;;  %v1926_v5 = vsel %vm1424_vm4, %v1904_v61, %v1925_v63  ;;  %v2539_v63 = vand.u32 4294901760, %v10406_v58 }
 0x207   : > { %v1908_v2 = vrot.slane %v1326_v0, %v10298_v33  ;;  %v1329_v3 = vpop.xlane.xlu0 %1328  ;;  %v1507_v4 = vand.u32 4294901760, %v1506_v62  ;;  %v10421_v0 = vld [vmem:[%s11640_s1 + $0x20] sm:$0xff] }
 0x208   : > { %v1912_v6 = vrot.slane %v1329_v3, %v10298_v33  ;;  %v10430_v3 = vpack.c.bf16 %v2536_v55, %v2533_v54 }
 0x209   : > { %v1927_v7 = vsel %vm1426_vm5, %v1908_v2, %v1926_v5  ;;  %v1508_v8 = vsub.f32 %v1506_v62, %v1507_v4  ;;  %v3403_v5 = vand.u32 4294901760, %v10421_v0 }
 0x20a   : > { %v1332_v17 = vpop.xlane.xlu1 %1331  ;;  %v1928_v27 = vsel %vm1428_vm6, %v1912_v6, %v1927_v7  ;;  %v3406_v7 = vand.u32 4294901760, %v10426_v1 }
 0x20b   : > { %v1916_v19 = vrot.slane %v1332_v17, %v10298_v33  ;;  %v1335_v25 = vpop.xlane.xlu0 %1334  ;;  %v1509_v26 = vand.u32 4294901760, %v1508_v8 }
 0x20c   : > { %v1920_v30 = vrot.slane %v1335_v25, %v10298_v33  ;;  %v10455_v17 = vpack.c.bf16 %v3406_v7, %v3403_v5 }
 0x20d   : > { %v1929_v32 = vsel %vm1430_vm7, %v1916_v19, %v1928_v27  ;;  %8663 = vmatmul.mubr.f32.vlgmr.msra.gmra.mrb[0].mxu1 %v1509_v26  ;;  %v10470_v26 = vsub.f32 %v2495_v42, %v2530_v46 }
 0x20e   : > { %8666 = vmatpush3.msra.mxu1 %v1520_v18  ;;  %v1338_v38 = vpop.xlane.xlu1 %1337  ;;  %8667 = vmatprep.mubr.msk.f32.mxu1 %vm9908_vm2, %v11573_v24  ;;  %v1930_v9 = vsel %vm1432_vm8, %v1920_v30, %v1929_v32  ;;  %v10460_v18 = vld [vmem:[%s11639_s2 + $0x30] sm:$0xff] }
 0x20f   : > { %v1924_v39 = vrot.slane %v1338_v38, %v10298_v33  ;;  %8670 = vmatprep.subr.mxu1 %v11573_v24  ;;  %v1935_v33 = vand.u32 4294901760, %v10337_v10  ;;  %v10466_v19 = vand.u32 4294901760, %v10460_v18  ;;  %v11577_v30 = vand.u32 4294901760, %v10470_v26  ;;  %v10479_v32 = vld [vmem:[%s11640_s1 + $0x30] sm:$0xff] }
 0x210   : > { %v10481_v38 = vsub.f32 %v3359_v43, %v3391_v49 }
 0x211   : > { %v1931_v11 = vsel %vm1434_vm9, %v1924_v39, %v1930_v9  ;;  %8668 = vmatmul.mubr.f32.vlgmr.msra.gmra.mrb[2].mxu1 %v1505_v57  ;;  %v2012_v16 = vsub.f32 %v10337_v10, %v1935_v33  ;;  %v10488_v9 = vand.u32 4294901760, %v10479_v32 }
 0x212   : > { %v1932_v12 = vsel %vm1436_vm10, %v1931_v11, 0  ;;  %8671 = vmatpush3.msra.mxu1 %v1517_v47  ;;  %8672 = vmatprep.mubr.msk.f32.mxu1 %vm9908_vm2, %v11573_v24  ;;  %v3360_v47 = vld [vmem:[%s11640_s1 + $0x8] sm:$0xff] }
 0x213   : > { %v2000_v14 = vand.u32 4294901760, %v1932_v12  ;;  %8675 = vmatprep.subr.mxu1 %v11573_v24  ;;  %v2013_v28 = vand.u32 4294901760, %v2012_v16  ;;  %v3394_v53 = vand.u32 4294901760, %v3360_v47 }
 0x215   : > { %8673 = vmatmul.mubr.f32.vlgmr.msra.gmra.mrb[4].mxu1 %v1506_v62  ;;  %v2001_v20 = vsub.f32 %v1932_v12, %v2000_v14  ;;  %v2014_v34 = vsub.f32 %v2012_v16, %v2013_v28  ;;  %v10415_v62 = vld [vmem:[%s11639_s2 + $0x28] sm:$0xff]  ;;  %v10428_v2 = vpack.c.bf16 %v3394_v53, %v3391_v49  ;;  %v10483_v39 = vsub.f32 %v3360_v47, %v3394_v53 }
 0x216   : > { %8676 = vmatpush3.msra.mxu1 %v10288_v23  ;;  %8677 = vmatprep.mubr.msk.f32.mxu1 %vm9908_vm2, %v11573_v24  ;;  %v2689_v12 = vsub.f32 %v10470_v26, %v11577_v30 }
 0x217   : > { %8680 = vmatprep.subr.mxu1 %v11573_v24  ;;  %v2002_v29 = vand.u32 4294901760, %v2001_v20  ;;  %v2015_v37 = vand.u32 4294901760, %v2014_v34  ;;  %9393 = vmatprep.subr.bf16.mxu0 %v10428_v2  ;;  %v10506_v34 = vsub.f32 %v2496_v50, %v2533_v54 }
 0x218   : > { %9395 = vmatpush3.bf16.msra.mxu0 %v10428_v2 }
 0x219   : > { %8678 = vmatmul.mubr.f32.vlgmr.msra.gmra.mrb[6].mxu1 %v1507_v4  ;;  %v2003_v36 = vsub.f32 %v2001_v20, %v2002_v29  ;;  %v2542_v4 = vand.u32 4294901760, %v10415_v62  ;;  %v2695_v42 = vand.u32 4294901760, %v10506_v34 }
 0x21a   : > { %8681 = vmatpush3.msra.mxu1 %v1518_v56  ;;  %8682 = vmatprep.mubr.msk.f32.mxu1 %vm9908_vm2, %v11573_v24  ;;  %v10396_v56 = vld [vmem:[%s11640_s1 + $0x10] sm:$0xff] }
 0x21b   : > { %8685 = vmatprep.subr.mxu1 %v11573_v24  ;;  %v2004_v41 = vand.u32 4294901760, %v2003_v36  ;;  %v3397_v60 = vand.u32 4294901760, %v10396_v56  ;;  %v10448_v8 = vpack.c.bf16 %v2542_v4, %v2539_v63  ;;  %v10508_v36 = vsub.f32 %v2497_v51, %v2536_v55 }
 0x21d   : > { %8683 = vmatmul.mubr.f32.vlgmr.msra.gmra.mrb[8].mxu1 %v1505_v57  ;;  %v2702_v43 = vand.u32 4294901760, %v10508_v36  ;;  %v3558_v53 = vsub.f32 %v10396_v56, %v3397_v60  ;;  %v3572_v56 = vsub.f32 %v10421_v0, %v3403_v5  ;;  %v10555_v5 = vpack.c.bf16 %v10508_v36, %v10506_v34 }
 0x21e   : > { %8686 = vmatpush3.msra.mxu1 %v10288_v23  ;;  %8687 = vmatprep.mubr.msk.f32.mxu1 %vm9908_vm2, %v11573_v24  ;;  %v2494_v23 = vld [vmem:[%s11639_s2] sm:$0xff]  ;;  %s7948_s2 = sshll.u32 %s11001_s17, 4  ;;  %s11399_s2 = int_to_ptr.vmem [resolvable:$true] %s7948_s2 }
 0x21f   : > { %8690 = vmatprep.subr.mxu1 %v11573_v24  ;;  %v2527_v44 = vand.u32 4294901760, %v2494_v23  ;;  %v2703_v47 = vsub.f32 %v10508_v36, %v2702_v43  ;;  %v3559_v55 = vand.u32 4294901760, %v3558_v53  ;;  %v11642_v36 = vand.u32 4294901760, %v10470_v26  ;;  %p9758_p0 = scmp.lt.s32.totalorder %s11399_s2, %s9756_s16 }
 0x221   : > { %8688 = vmatmul.mubr.f32.vlgmr.msra.gmra.mrb[10].mxu1 %v1505_v57  ;;  %v10401_v57 = vld [vmem:[%s11640_s1 + $0x18] sm:$0xff]  ;;  %v10408_v59 = vpack.c.bf16 %v2530_v46, %v2527_v44  ;;  %v10468_v25 = vsub.f32 %v2494_v23, %v2527_v44  ;;  %v2696_v46 = vsub.f32 %v10506_v34, %v2695_v42  ;;  %v2704_v50 = vand.u32 4294901760, %v2703_v47  ;;  %s11392_s1 = scalar_lea.hbm %s11569_s11, %s11386_s26 }
 0x222   : > { %8691 = vmatpush3.msra.mxu1 %v1935_v33  ;;  %8692 = vmatprep.mubr.msk.f32.mxu1 %vm9908_vm2, %v11573_v24  ;;  %v3400_v61 = vand.u32 4294901760, %v10401_v57 }
 0x223   : > { %8695 = vmatprep.subr.mxu1 %v11573_v24  ;;  %v11578_v27 = vand.u32 4294901760, %v10468_v25  ;;  %v2697_v49 = vand.u32 4294901760, %v2696_v46  ;;  %v10547_v0 = vpack.c.bf16 %v10470_v26, %v10468_v25  ;;  %v11641_v34 = vand.u32 4294901760, %v10468_v25 }
 0x224   : > { %v10439_v6 = vpack.c.bf16 %v3400_v61, %v3397_v60  ;;  %v3565_v54 = vsub.f32 %v10401_v57, %v3400_v61  ;;  %v3579_v57 = vsub.f32 %v10426_v1, %v3406_v7  ;;  %v10551_v1 = vpack.c.bf16 %v10483_v39, %v10481_v38 }
 0x225   : > { %8693 = vmatmul.mubr.f32.vlgmr.msra.gmra.mrb[12].mxu1 %v2004_v41  ;;  %v2682_v11 = vsub.f32 %v10468_v25, %v11578_v27  ;;  %v10521_v51 = vpack.c.bf16 %v2704_v50, %v2697_v49  ;;  %v3573_v49 = vand.u32 4294901760, %v3572_v56 }
 0x226   : > { %8696 = vmatpush3.msra.mxu1 %v2015_v37  ;;  %8697 = vmatprep.mubr.msk.f32.mxu1 %vm9908_vm2, %v11573_v24  ;;  %v10557_v7 = vpack.c.bf16 %v3565_v54, %v3558_v53 }
 0x227   : > { %8700 = vmatprep.subr.mxu1 %v11573_v24  ;;  %9397 = vmatprep.subr.bf16.mxu0 %v10439_v6 }
 0x228   : > { %9399 = vmatpush3.bf16.msra.mxu0 %v10439_v6 }
 0x229   : > { %8698 = vmatmul.mubr.f32.vlgmr.msra.gmra.mrb[14].mxu1 %v2000_v14  ;;  %9401 = vmatprep.subr.bf16.mxu0 %v10455_v17 }
 0x22a   : > { %8701 = vmatpush3.msra.mxu1 %v2012_v16  ;;  %8702 = vmatprep.mubr.msk.f32.mxu1 %vm9908_vm2, %v11573_v24  ;;  %v2683_v16 = vand.u32 4294901760, %v2682_v11  ;;  %v3566_v11 = vand.u32 4294901760, %v3565_v54 }
 0x22b   : > { %8705 = vmatprep.subr.mxu1 %v11573_v24 }
 0x22c   : > { %9403 = vmatpush3.bf16.msra.mxu0 %v10455_v17 }
 0x22d   : > { %8703 = vmatmul.mubr.f32.vlgmr.msra.gmra.mrb[16].mxu1 %v2001_v20  ;;  %8888 = vmatprep.subr.mxu0 %v10488_v9  ;;  %v2690_v20 = vand.u32 4294901760, %v2689_v12  ;;  %v3560_v12 = vsub.f32 %v3558_v53, %v3559_v55  ;;  %v10567_v53 = vpack.c.bf16 %v11642_v36, %v11641_v34 }
 0x22e   : > { %8706 = vmatpush3.msra.mxu1 %v1935_v33  ;;  %8707 = vmatprep.mubr.msk.f32.mxu1 %vm9908_vm2, %v11573_v24 }
 0x22f   : > { %8710 = vmatprep.subr.mxu1 %v11573_v24  ;;  %v10510_v37 = vpack.c.bf16 %v2690_v20, %v2683_v16  ;;  %v3567_v16 = vsub.f32 %v3565_v54, %v3566_v11  ;;  %v2708_v20 = vsub.f32 %v10406_v58, %v2539_v63  ;;  %v3580_v58 = vand.u32 4294901760, %v3579_v57  ;;  %11643 = vst [vmem:[#allocation21_spill] sm:$0xff] %v10567_v53 }
 0x230   : > { %8889 = vmatpush3.msra.mxu0 %v10488_v9 }
 0x231   : > { %8708 = vmatmul.mubr.f32.vlgmr.msra.gmra.mrb[18].mxu1 %v2002_v29  ;;  %v3581_v50 = vsub.f32 %v3579_v57, %v3580_v58 }
 0x232   : > { %8711 = vmatpush3.msra.mxu1 %v2013_v28  ;;  %8712 = vmatprep.mubr.msk.f32.mxu1 %vm9908_vm2, %v11573_v24 }
 0x233   : > { %8715 = vmatprep.subr.mxu1 %v11573_v24 }
 0x235   : > { %8713 = vmatmul.mubr.f32.vlgmr.msra.gmra.mrb[20].mxu1 %v2000_v14 }
 0x236   : > { %8716 = vmatpush3.msra.mxu1 %v1935_v33  ;;  %8717 = vmatprep.mubr.msk.f32.mxu1 %vm9908_vm2, %v11573_v24  ;;  %v11576_v33 = vand.u32 4294901760, %v10481_v38  ;;  %v3582_v24 = vand.u32 4294901760, %v3581_v50 }
 0x237   : > { %9321 = vmatprep.subr.bf16.mxu1 %v10408_v59 }
 0x238   : > { %v3546_v28 = vsub.f32 %v10481_v38, %v11576_v33 }
 0x239   : > { %8718 = vmatmul.mubr.f32.vlgmr.msra.gmra.mrb[22].mxu1 %v2000_v14  ;;  %v11575_v14 = vand.u32 4294901760, %v10483_v39 }
 0x23a   : > { %9323 = vmatpush3.bf16.msra.mxu1 %v10408_v59  ;;  %v3547_v41 = vand.u32 4294901760, %v3546_v28  ;;  %v2715_v28 = vsub.f32 %v10415_v62, %v2542_v4  ;;  %v3574_v4 = vsub.f32 %v3572_v56, %v3573_v49 }
 0x23b   : > { %9325 = vmatprep.subr.bf16.mxu1 %v10430_v3  ;;  %v3553_v29 = vsub.f32 %v10483_v39, %v11575_v14 }
 0x23c   : > { %v2716_v46 = vand.u32 4294901760, %v2715_v28 }
 0x23d   : > { %v3554_v23 = vand.u32 4294901760, %v3553_v29  ;;  %v3561_v29 = vand.u32 4294901760, %v3560_v12 }
 0x23e   : > { %9327 = vmatpush3.bf16.msra.mxu1 %v10430_v3  ;;  %v2717_v47 = vsub.f32 %v2715_v28, %v2716_v46 }
 0x23f   : > { %9329 = vmatprep.subr.bf16.mxu1 %v10448_v8  ;;  %v10516_v44 = vpack.c.bf16 %v3554_v23, %v3547_v41  ;;  %v3568_v41 = vand.u32 4294901760, %v3567_v16  ;;  %v2709_v23 = vand.u32 4294901760, %v2708_v20  ;;  %v3575_v16 = vand.u32 4294901760, %v3574_v4 }
 0x240   : > { %v2718_v62 = vand.u32 4294901760, %v2717_v47 }
 0x241   : > { %9405 = vmatprep.subr.bf16.mxu0 %v10516_v44  ;;  %v10539_v60 = vpack.c.bf16 %v3568_v41, %v3561_v29  ;;  %v2710_v61 = vsub.f32 %v2708_v20, %v2709_v23  ;;  %v10543_v14 = vpack.c.bf16 %v3582_v24, %v3575_v16  ;;  %v10559_v29 = vpack.c.bf16 %v2715_v28, %v2708_v20 }
 0x242   : > { %9331 = vmatpush3.bf16.msra.mxu1 %v10448_v8  ;;  %v10561_v41 = vpack.c.bf16 %v3579_v57, %v3572_v56  ;;  %v11644_v56 = vand.u32 4294901760, %v10481_v38  ;;  %v11645_v57 = vand.u32 4294901760, %v10483_v39  ;;  %v10579_v25 = vpack.c.bf16 %v2716_v46, %v2709_v23 }
 0x243   : > { %8732 = vmatprep.subr.mxu1 %v10466_v19  ;;  %v2711_v63 = vand.u32 4294901760, %v2710_v61 }
 0x244   : > { %11649 = vst [vmem:[#allocation25_spill] sm:$0xff] %v10579_v25 }
 0x245   : > { %v10541_v12 = vpack.c.bf16 %v2718_v62, %v2711_v63 }
 0x246   : > { %8733 = vmatpush3.msra.mxu1 %v10466_v19 }
 0x247   : > { %9333 = vmatprep.subr.bf16.mxu1 %v10510_v37 }
 0x2e0   : > { %v1511_v24 = vpop.f32.mrb[0].mxu1 }
 0x2e1   : > { %v8664_v61 = vpop.f32.mrb[1].mxu1 }
 0x2e2   : > { %v10575_v61 = vpack.c.bf16 %v2702_v43, %v2695_v42 }
 0x2e4   : > { %v1587_v47 = vpop.f32.mrb[2].mxu1  ;;  %11647 = vst [vmem:[#allocation23_spill] sm:$0xff] %v10575_v61 }
 0x2e5   : > { %v1588_v63 = vadd.f32 %v1587_v47, %v1511_v24  ;;  %v8669_v62 = vpop.f32.mrb[3].mxu1  ;;  %v10573_v24 = vpack.c.bf16 %v11645_v57, %v11644_v56  ;;  %v9910_v57 = vmov 1966171168  }
 0x2e7   : > { %11646 = vst [vmem:[#allocation22_spill] sm:$0xff] %v10573_v24 }
 0x2e8   : > { %v1661_v4 = vpop.f32.mrb[4].mxu1 }
 0x2e9   : > { %v1662_v50 = vadd.f32 %v1661_v4, %v1588_v63  ;;  %v8674_v16 = vpop.f32.mrb[5].mxu1  ;;  %v10577_v63 = vpack.c.bf16 %v3566_v11, %v3559_v55  ;;  %v2388_v11 = vpop.permute.xlu0 %2387 }
 0x2eb   : > { %11648 = vst [vmem:[#allocation24_spill] sm:$0xff] %v10577_v63 }
 0x2ec   : > { %v1735_v33 = vpop.f32.mrb[6].mxu1 }
 0x2ed   : > { %v1736_v30 = vadd.f32 %v1735_v33, %v1662_v50  ;;  %v8679_v27 = vpop.f32.mrb[7].mxu1 }
 0x2f0   : > { %v1809_v48 = vpop.f32.mrb[8].mxu1 }
 0x2f1   : > { %v1810_v54 = vadd.f32 %v1809_v48, %v1736_v30  ;;  %v8684_v20 = vpop.f32.mrb[9].mxu1  ;;  %v10581_v30 = vpack.c.bf16 %v3580_v58, %v3573_v49 }
 0x2f3   : > { %11650 = vst [vmem:[#allocation26_spill] sm:$0xff] %v10581_v30 }
 0x2f4   : > { %v1881_v28 = vpop.f32.mrb[10].mxu1 }
 0x2f5   : > { %v1882_v33 = vadd.f32 %v1881_v28, %v1810_v54  ;;  %v8689_v27 = vpop.f32.mrb[11].mxu1 }
 0x2f8   : > { %v2006_v47 = vpop.f32.mrb[12].mxu1 }
 0x2f9   : > { %v2007_v26 = vadd.f32 %v2006_v47, %v1882_v33  ;;  %v8694_v62 = vpop.f32.mrb[13].mxu1  ;;  %v2399_v33 = vunpack.c.l.s4 %v9910_v57  ;;  %v10585_v47 = vsub.f32 %v10460_v18, %v10466_v19 }
 0x2fb   : > { %v2400_v27 = vunpack.c.0.s8 %v2399_v33  ;;  %v10589_v62 = vand.u32 4294901760, %v10585_v47 }
 0x2fc   : > { %v2082_v48 = vpop.f32.mrb[14].mxu1 }
 0x2fd   : > { %v2083_v4 = vadd.f32 %v2082_v48, %v2007_v26  ;;  %v8699_v38 = vpop.f32.mrb[15].mxu1  ;;  %v2403_v26 = vsub.s32 %v2400_v27, %v10295_v31  ;;  %11651 = vst [vmem:[#allocation27_spill] sm:$0xff] %v10589_v62  ;;  %v10593_v48 = vsub.f32 %v10479_v32, %v10488_v9 }
 0x2ff   : > { %v10601_v18 = vand.u32 4294901760, %v10593_v48 }
 0x300   : > { %v2156_v50 = vpop.f32.mrb[16].mxu1 }
 0x301   : > { %v2157_v39 = vadd.f32 %v2156_v50, %v2083_v4  ;;  %v8704_v16 = vpop.f32.mrb[17].mxu1  ;;  %11652 = vst [vmem:[#allocation28_spill] sm:$0xff] %v10601_v18 }
 0x302   : > { %v2724_v16 = vsub.f32 %v10585_v47, %v10589_v62 }
 0x304   : > { %v2230_v34 = vpop.f32.mrb[18].mxu1 }
 0x305   : > { %v2231_v42 = vadd.f32 %v2230_v34, %v2157_v39  ;;  %v8709_v43 = vpop.f32.mrb[19].mxu1  ;;  %v10596_v39 = vsub.s32 0, %v10295_v31 }
 0x308   : > { %v2304_v36 = vpop.f32.mrb[20].mxu1 }
 0x309   : > { %v2305_v54 = vadd.f32 %v2304_v36, %v2231_v42  ;;  %v8714_v20 = vpop.f32.mrb[21].mxu1 }
 0x30c   : > { %v2376_v55 = vpop.f32.mrb[22].mxu1 }
 0x30d   : > { %v2377_v23 = vadd.f32 %v2376_v55, %v2305_v54  ;;  %v8719_v46 = vpop.f32.mrb[23].mxu1 }
 0x30f   : > { %v2390_v28 = vadd.f32 %v2388_v11, %v2377_v23  ;;  %v10606_v11 = vand.u32 4294901760, %v2724_v16 }
 0x311   : > { %vm2391_vm11 = vcmp.ge.f32.partialorder %v2390_v28, 0.0  ;;  %v2392_v56 = vmul.f32 0.2, %v2390_v28 }
 0x313   : > { %v2393_v49 = vsel %vm2391_vm11, %v2390_v28, %v2392_v56 }
 0x314   : > { %v2394_v58 = vmul.f32 1.442695, %v2393_v49 }
 0x316   : > { %9733 = vpow2.f32 %v2394_v58 }
 0x320   : > { %v9734_v4 = vpop.eup %9733 }
 0x321   : > { %v2397_v38 = vcombine.high %v9734_v4, %v9734_v4  ;;  %v2404_v50 = vrot.slane %v9734_v4, %v2403_v26 }
 0x323   : > { %v2412_v34 = vcombine.high %v2404_v50, %v2404_v50  ;;  %v2420_v42 = vrot.slane %v2404_v50, %v2403_v26  ;;  %v2411_v43 = vrot.slane %v2397_v38, %v2403_v26 }
 0x325   : > { %v2449_v36 = vrot.slane %v2420_v42, %v10596_v39  ;;  %v2434_v54 = vrot.slane %v2412_v34, %v2403_v26  ;;  %v2442_v32 = vcombine.high %v2420_v42, %v2420_v42  ;;  %v10604_v20 = vrot.slane %v2411_v43, %v2403_v26 }
 0x326   : > { %v2413_v55 = vcombine.high %v2411_v43, %v2411_v43 }
 0x327   : > { %v2486_v23 = vmul.f32 %v2449_v36, %v10337_v10  ;;  %v3351_v46 = vmul.f32 %v2449_v36, %v10285_v22  ;;  %v2453_v28 = vrot.slane %v2434_v54, %v10596_v39  ;;  %v2457_v56 = vrot.slane %v2442_v32, %v10596_v39 }
 0x328   : > { %v2444_v49 = vcombine.high %v2434_v54, %v2434_v54  ;;  %v2465_v58 = vrot.slane %v10604_v20, %v10596_v39  ;;  %v10616_v57 = vrot.slane %v2413_v55, %v2403_v26  ;;  %v2443_v33 = vcombine.high %v10604_v20, %v10604_v20 }
 0x329   : > { %v2503_v27 = vsel %vm2501_vm12, %v2486_v23, 0  ;;  %v3367_v4 = vsel %vm2501_vm12, %v3351_v46, 0  ;;  %v2487_v38 = vmul.f32 %v2453_v28, %v10337_v10  ;;  %v3352_v50 = vmul.f32 %v2453_v28, %v10285_v22 }
 0x32a   : > { %v10624_v16 = vand.u32 4294901760, %v2503_v27  ;;  %v10626_v34 = vand.u32 4294901760, %v3367_v4  ;;  %v2488_v42 = vmul.f32 %v2457_v56, %v10337_v10  ;;  %v3353_v26 = vmul.f32 %v2457_v56, %v10285_v22 }
 0x32b   : > { %v2506_v43 = vsel %vm2501_vm12, %v2487_v38, 0  ;;  %v3370_v36 = vsel %vm2501_vm12, %v3352_v50, 0  ;;  %v2461_v54 = vrot.slane %v2444_v49, %v10596_v39  ;;  %v2490_v32 = vmul.f32 %v2465_v58, %v10337_v10 }
 0x32c   : > { %v10635_v20 = vsub.f32 %v2503_v27, %v10624_v16  ;;  %v10638_v55 = vsub.f32 %v3367_v4, %v10626_v34  ;;  %v10640_v23 = vand.u32 4294901760, %v2506_v43  ;;  %v10642_v46 = vand.u32 4294901760, %v3370_v36 }
 0x32d   : > { %v2509_v28 = vsel %vm2501_vm12, %v2488_v42, 0  ;;  %v3373_v56 = vsel %vm2501_vm12, %v3353_v26, 0  ;;  %v2489_v38 = vmul.f32 %v2461_v54, %v10337_v10  ;;  %v3354_v49 = vmul.f32 %v2461_v54, %v10285_v22 }
 0x32e   : > { %v11593_v50 = vand.u32 4294901760, %v10635_v20  ;;  %v11594_v27 = vand.u32 4294901760, %v10638_v55  ;;  %v10651_v31 = vsub.f32 %v2506_v43, %v10640_v23  ;;  %v10654_v4 = vsub.f32 %v3370_v36, %v10642_v46 }
 0x32f   : > { %v10656_v40 = vand.u32 4294901760, %v2509_v28  ;;  %v10658_v52 = vand.u32 4294901760, %v3373_v56  ;;  %v2512_v42 = vsel %vm2501_vm12, %v2489_v38, 0  ;;  %v3376_v26 = vsel %vm2501_vm12, %v3354_v49, 0 }
 0x330   : > { %v2601_v54 = vsub.f32 %v10635_v20, %v11593_v50  ;;  %v3465_v43 = vsub.f32 %v10638_v55, %v11594_v27  ;;  %v11600_v21 = vand.u32 4294901760, %v10651_v31  ;;  %v11602_v36 = vand.u32 4294901760, %v10654_v4 }
 0x331   : > { %v10671_v45 = vsub.f32 %v2509_v28, %v10656_v40  ;;  %v10674_v13 = vsub.f32 %v3373_v56, %v10658_v52  ;;  %v10676_v38 = vand.u32 4294901760, %v2512_v42  ;;  %v10678_v49 = vand.u32 4294901760, %v3376_v26 }
 0x332   : > { %v2602_v35 = vand.u32 4294901760, %v2601_v54  ;;  %v3466_v50 = vand.u32 4294901760, %v3465_v43  ;;  %v2611_v27 = vsub.f32 %v10651_v31, %v11600_v21  ;;  %v3475_v15 = vsub.f32 %v10654_v4, %v11602_v36 }
 0x333   : > { %v11607_v28 = vand.u32 4294901760, %v10671_v45  ;;  %v11606_v62 = vand.u32 4294901760, %v10674_v13  ;;  %v10689_v56 = vsub.f32 %v2512_v42, %v10676_v38  ;;  %v10692_v30 = vsub.f32 %v3376_v26, %v10678_v49 }
 0x334   : > { %8734 = vmatprep.mubr.f32.mxu1 %v2602_v35  ;;  %8890 = vmatprep.mubr.f32.mxu0 %v3466_v50  ;;  %v2612_v54 = vand.u32 4294901760, %v2611_v27  ;;  %v3476_v43 = vand.u32 4294901760, %v3475_v15  ;;  %v2515_v21 = vsel %vm2501_vm12, %v2490_v32, 0  ;;  %v3355_v25 = vmul.f32 %v2465_v58, %v10285_v22 }
 0x335   : > { %v2621_v36 = vsub.f32 %v10671_v45, %v11607_v28  ;;  %v3485_v42 = vsub.f32 %v10674_v13, %v11606_v62  ;;  %v11604_v63 = vand.u32 4294901760, %v10689_v56  ;;  %v11605_v26 = vand.u32 4294901760, %v10692_v30 }
 0x336   : > { %8735 = vmatmul.mubr.f32.vlgmr.msra.gmra.mrb[24].mxu1 %v2612_v54  ;;  %8891 = vmatmul.mubr.f32.vlgmr.msra.gmra.mrb[8].mxu0 %v3476_v43  ;;  %v10704_v35 = vand.u32 4294901760, %v2515_v21  ;;  %v3379_v15 = vsel %vm2501_vm12, %v3355_v25, 0  ;;  %v2469_v58 = vrot.slane %v10616_v57, %v10596_v39  ;;  %v2473_v32 = vrot.slane %v2443_v33, %v10596_v39 }
 0x337   : > { %9335 = vmatpush3.bf16.msra.mxu1 %v10510_v37  ;;  %v2622_v50 = vand.u32 4294901760, %v2621_v36  ;;  %v3486_v27 = vand.u32 4294901760, %v3485_v42  ;;  %9407 = vmatpush3.bf16.msra.mxu0 %v10516_v44  ;;  %v2631_v54 = vsub.f32 %v10689_v56, %v11604_v63  ;;  %v3495_v43 = vsub.f32 %v10692_v30, %v11605_v26 }
 0x338   : > { %9337 = vmatprep.subr.bf16.mxu1 %v10521_v51  ;;  %v10720_v25 = vsub.f32 %v2515_v21, %v10704_v35  ;;  %v10722_v33 = vand.u32 4294901760, %v3379_v15  ;;  %9409 = vmatprep.subr.bf16.mxu0 %v10539_v60  ;;  %v2491_v37 = vmul.f32 %v2469_v58, %v10337_v10  ;;  %v3356_v44 = vmul.f32 %v2469_v58, %v10285_v22 }
 0x339   : > { %8737 = vmatprep.mubr.f32.mxu1 %v2622_v50  ;;  %8893 = vmatprep.mubr.f32.mxu0 %v3486_v27  ;;  %v2632_v36 = vand.u32 4294901760, %v2631_v54  ;;  %v3496_v42 = vand.u32 4294901760, %v3495_v43  ;;  %v2492_v63 = vmul.f32 %v2473_v32, %v10337_v10  ;;  %v3357_v26 = vmul.f32 %v2473_v32, %v10285_v22 }
 0x33a   : > { %v11609_v62 = vand.u32 4294901760, %v10720_v25  ;;  %v10731_v21 = vsub.f32 %v3379_v15, %v10722_v33  ;;  %v2518_v28 = vsel %vm2501_vm12, %v2491_v37, 0  ;;  %v3382_v61 = vsel %vm2501_vm12, %v3356_v44, 0 }
 0x33b   : > { %8738 = vmatmul.mubr.f32.gmra.mrb[26].mxu1 %v2632_v36  ;;  %8894 = vmatmul.mubr.f32.gmra.mrb[10].mxu0 %v3496_v42  ;;  %v10735_v58 = vand.u32 4294901760, %v2518_v28  ;;  %v10737_v50 = vand.u32 4294901760, %v3382_v61  ;;  %v2521_v27 = vsel %vm2501_vm12, %v2492_v63, 0  ;;  %v3385_v54 = vsel %vm2501_vm12, %v3357_v26, 0 }
 0x33c   : > { %9339 = vmatpush3.bf16.msra.mxu1 %v10521_v51  ;;  %v2641_v15 = vsub.f32 %v10720_v25, %v11609_v62  ;;  %v11615_v32 = vand.u32 4294901760, %v10731_v21  ;;  %9411 = vmatpush3.bf16.msra.mxu0 %v10539_v60  ;;  %v10747_v43 = vand.u32 4294901760, %v2521_v27  ;;  %v10749_v37 = vand.u32 4294901760, %v3385_v54 }
 0x33d   : > { %9341 = vmatprep.subr.bf16.mxu1 %v10541_v12  ;;  %v10753_v63 = vsub.f32 %v2518_v28, %v10735_v58  ;;  %v10756_v26 = vsub.f32 %v3382_v61, %v10737_v50  ;;  %9413 = vmatprep.subr.bf16.mxu0 %v10543_v14  ;;  %v2445_v51 = vcombine.high %v10616_v57, %v10616_v57 }
 0x33e   : > { %v11653_v60 = vsub.f32 %v10593_v48, %v10601_v18  ;;  %v2642_v36 = vand.u32 4294901760, %v2641_v15  ;;  %v3505_v42 = vsub.f32 %v10731_v21, %v11615_v32  ;;  %v10768_v28 = vsub.f32 %v2521_v27, %v10747_v43 }
 0x33f   : > { %v10771_v61 = vsub.f32 %v3385_v54, %v10749_v37  ;;  %v11614_v62 = vand.u32 4294901760, %v10753_v63  ;;  %v11613_v24 = vand.u32 4294901760, %v10756_v26  ;;  %v2477_v57 = vrot.slane %v2445_v51, %v10596_v39 }
 0x340   : > { %v3589_v44 = vand.u32 4294901760, %v11653_v60  ;;  %8740 = vmatprep.mubr.f32.mxu1 %v2642_v36  ;;  %v3506_v18 = vand.u32 4294901760, %v3505_v42  ;;  %9343 = vmatpush3.bf16.msra.mxu1 %v10541_v12  ;;  %v2660_v15 = vand.u32 4294901760, %v10768_v28 }
 0x341   : > { %v3524_v60 = vand.u32 4294901760, %v10771_v61  ;;  %v2651_v27 = vsub.f32 %v10753_v63, %v11614_v62  ;;  %v3515_v54 = vsub.f32 %v10756_v26, %v11613_v24  ;;  %8758 = vmatprep.subr.mxu1 %v10606_v11  ;;  %9415 = vmatpush3.bf16.msra.mxu0 %v10543_v14  ;;  %v2493_v39 = vmul.f32 %v2477_v57, %v10337_v10 }
 0x342   : > { %8896 = vmatprep.mubr.f32.mxu0 %v3506_v18  ;;  %v2661_v12 = vsub.f32 %v10768_v28, %v2660_v15  ;;  %v3358_v36 = vmul.f32 %v2477_v57, %v10285_v22  ;;  %8914 = vmatprep.subr.mxu0 %v3589_v44 }
 0x343   : > { %v3525_v51 = vsub.f32 %v10771_v61, %v3524_v60  ;;  %v2652_v42 = vand.u32 4294901760, %v2651_v27  ;;  %v3516_v24 = vand.u32 4294901760, %v3515_v54  ;;  %v2524_v62 = vsel %vm2501_vm12, %v2493_v39, 0  ;;  %v11670_v39 = vld [vmem:[#allocation26_spill] sm:$0xff] }
 0x344   : > { %v2662_v32 = vand.u32 4294901760, %v2661_v12  ;;  %v10796_v53 = vand.u32 4294901760, %v2524_v62  ;;  %8759 = vmatpush3.msra.mxu1 %v10606_v11  ;;  %v3388_v10 = vsel %vm2501_vm12, %v3358_v36, 0 }
 0x345   : > { %v3526_v14 = vand.u32 4294901760, %v3525_v51  ;;  %8741 = vmatmul.mubr.f32.gmra.mrb[28].mxu1 %v2652_v42  ;;  %8897 = vmatmul.mubr.f32.gmra.mrb[12].mxu0 %v3516_v24  ;;  %v10800_v18 = vand.u32 4294901760, %v3388_v10 }
 0x346   : > { %8743 = vmatprep.mubr.f32.mxu1 %v2662_v32  ;;  %v10803_v22 = vsub.f32 %v2524_v62, %v10796_v53  ;;  %9345 = vmatprep.subr.bf16.mxu1 %v10547_v0 }
 0x347   : > { %8899 = vmatprep.mubr.f32.mxu0 %v3526_v14  ;;  %v10806_v57 = vsub.f32 %v3388_v10, %v10800_v18  ;;  %8915 = vmatpush3.msra.mxu0 %v3589_v44  ;;  %v11668_v44 = vld [vmem:[#allocation25_spill] sm:$0xff] }
 0x348   : > { %v2670_v27 = vand.u32 4294901760, %v10803_v22  ;;  %9417 = vmatprep.subr.bf16.mxu0 %v10551_v1 }
 0x349   : > { %v3534_v11 = vand.u32 4294901760, %v10806_v57 }
 0x34a   : > { %v2671_v24 = vsub.f32 %v10803_v22, %v2670_v27 }
 0x34b   : > { %v3535_v62 = vsub.f32 %v10806_v57, %v3534_v11 }
 0x34c   : > { %v2672_v32 = vand.u32 4294901760, %v2671_v24 }
 0x34d   : > { %v3536_v54 = vand.u32 4294901760, %v3535_v62 }
 0x34e   : > { %8744 = vmatmul.mubr.f32.gmra.mrb[30].mxu1 %v2672_v32 }
 0x34f   : > { %8900 = vmatmul.mubr.f32.gmra.mrb[14].mxu0 %v3536_v54  ;;  %8760 = vmatprep.mubr.f32.mxu1 %v10624_v16 }
 0x350   : > { %8916 = vmatprep.mubr.f32.mxu0 %v10626_v34 }
 0x352   : > { %8761 = vmatmul.mubr.f32.vlgmr.msra.gmra.mrb[24].mxu1 %v10640_v23 }
 0x353   : > { %9347 = vmatpush3.bf16.msra.mxu1 %v10547_v0  ;;  %8917 = vmatmul.mubr.f32.vlgmr.msra.gmra.mrb[8].mxu0 %v10642_v46  ;;  %v11654_v0 = vand.u32 4294901760, %v10635_v20 }
 0x354   : > { %8763 = vmatprep.mubr.f32.mxu1 %v10656_v40  ;;  %8919 = vmatprep.mubr.f32.mxu0 %v10658_v52 }
 0x355   : > { %9349 = vmatprep.subr.bf16.mxu1 %v10555_v5  ;;  %9419 = vmatpush3.bf16.msra.mxu0 %v10551_v1  ;;  %v11655_v1 = vand.u32 4294901760, %v10638_v55 }
 0x356   : > { %8764 = vmatmul.mubr.f32.gmra.mrb[26].mxu1 %v10676_v38  ;;  %9421 = vmatprep.subr.bf16.mxu0 %v10557_v7 }
 0x357   : > { %9351 = vmatpush3.bf16.msra.mxu1 %v10555_v5  ;;  %8920 = vmatmul.mubr.f32.gmra.mrb[10].mxu0 %v10678_v49  ;;  %v11656_v5 = vld [vmem:[#allocation21_spill] sm:$0xff] }
 0x358   : > { %8766 = vmatprep.mubr.f32.mxu1 %v10704_v35  ;;  %8922 = vmatprep.mubr.f32.mxu0 %v10722_v33 }
 0x359   : > { %9353 = vmatprep.subr.bf16.mxu1 %v10559_v29  ;;  %9423 = vmatpush3.bf16.msra.mxu0 %v10557_v7  ;;  %v11657_v7 = vand.u32 4294901760, %v10651_v31 }
 0x35a   : > { %8767 = vmatmul.mubr.f32.gmra.mrb[28].mxu1 %v10735_v58  ;;  %9425 = vmatprep.subr.bf16.mxu0 %v10561_v41 }
 0x35b   : > { %9355 = vmatpush3.bf16.msra.mxu1 %v10559_v29  ;;  %8923 = vmatmul.mubr.f32.gmra.mrb[12].mxu0 %v10737_v50  ;;  %v11658_v29 = vld [vmem:[#allocation22_spill] sm:$0xff] }
 0x35c   : > { %8769 = vmatprep.mubr.f32.mxu1 %v10747_v43  ;;  %8925 = vmatprep.mubr.f32.mxu0 %v10749_v37 }
 0x35d   : > { %8784 = vmatprep.subr.mxu1 %v10585_v47  ;;  %9427 = vmatpush3.bf16.msra.mxu0 %v10561_v41  ;;  %v11659_v41 = vand.u32 4294901760, %v10654_v4 }
 0x35e   : > { %8770 = vmatmul.mubr.f32.gmra.mrb[30].mxu1 %v10796_v53  ;;  %8940 = vmatprep.subr.mxu0 %v10593_v48 }
 0x35f   : > { %8785 = vmatpush3.msra.mxu1 %v10585_v47  ;;  %8926 = vmatmul.mubr.f32.gmra.mrb[14].mxu0 %v10800_v18  ;;  %v11660_v47 = vand.u32 4294901760, %v10671_v45 }
 0x360   : > { %8786 = vmatprep.mubr.f32.mxu1 %v10635_v20  ;;  %8942 = vmatprep.mubr.f32.mxu0 %v10638_v55  ;;  %v11662_v20 = vld [vmem:[#allocation23_spill] sm:$0xff]  ;;  %v11664_v55 = vld [vmem:[#allocation24_spill] sm:$0xff] }
 0x361   : > { %9357 = vmatprep.subr.bf16.mxu1 %v10408_v59  ;;  %8941 = vmatpush3.msra.mxu0 %v10593_v48  ;;  %v11661_v48 = vand.u32 4294901760, %v10674_v13 }
 0x362   : > { %8787 = vmatmul.mubr.f32.vlgmr.msra.gmra.mrb[24].mxu1 %v10651_v31  ;;  %9429 = vmatprep.subr.bf16.mxu0 %v10428_v2  ;;  %v11663_v31 = vand.u32 4294901760, %v10689_v56 }
 0x363   : > { %9359 = vmatpush3.bf16.msra.mxu1 %v10408_v59  ;;  %8943 = vmatmul.mubr.f32.vlgmr.msra.gmra.mrb[8].mxu0 %v10654_v4  ;;  %v11665_v4 = vand.u32 4294901760, %v10692_v30 }
 0x364   : > { %8789 = vmatprep.mubr.f32.mxu1 %v10671_v45  ;;  %8945 = vmatprep.mubr.f32.mxu0 %v10674_v13  ;;  %v11666_v45 = vand.u32 4294901760, %v10720_v25  ;;  %v11667_v13 = vand.u32 4294901760, %v10731_v21 }
 0x365   : > { %9361 = vmatprep.subr.bf16.mxu1 %v10430_v3  ;;  %9431 = vmatpush3.bf16.msra.mxu0 %v10428_v2 }
 0x366   : > { %8790 = vmatmul.mubr.f32.gmra.mrb[26].mxu1 %v10689_v56  ;;  %9433 = vmatprep.subr.bf16.mxu0 %v10439_v6  ;;  %v11669_v56 = vand.u32 4294901760, %v10753_v63 }
 0x367   : > { %9363 = vmatpush3.bf16.msra.mxu1 %v10430_v3  ;;  %8946 = vmatmul.mubr.f32.gmra.mrb[10].mxu0 %v10692_v30  ;;  %v11671_v30 = vand.u32 4294901760, %v10756_v26 }
 0x368   : > { %8792 = vmatprep.mubr.f32.mxu1 %v10720_v25  ;;  %8948 = vmatprep.mubr.f32.mxu0 %v10731_v21  ;;  %v11672_v25 = vld [vmem:[#allocation27_spill] sm:$0xff]  ;;  %v11673_v21 = vld [vmem:[#allocation28_spill] sm:$0xff] }
 0x369   : > { %9365 = vmatprep.subr.bf16.mxu1 %v10448_v8  ;;  %9435 = vmatpush3.bf16.msra.mxu0 %v10439_v6 }
 0x36a   : > { %8793 = vmatmul.mubr.f32.gmra.mrb[28].mxu1 %v10753_v63  ;;  %9437 = vmatprep.subr.bf16.mxu0 %v10455_v17 }
 0x36b   : > { %9367 = vmatpush3.bf16.msra.mxu1 %v10448_v8  ;;  %8949 = vmatmul.mubr.f32.gmra.mrb[12].mxu0 %v10756_v26 }
 0x36c   : > { %8795 = vmatprep.mubr.f32.mxu1 %v10768_v28  ;;  %8951 = vmatprep.mubr.f32.mxu0 %v10771_v61 }
 0x36d   : > { %8810 = vmatprep.subr.mxu1 %v10466_v19  ;;  %9439 = vmatpush3.bf16.msra.mxu0 %v10455_v17 }
 0x36e   : > { %8796 = vmatmul.mubr.f32.gmra.mrb[30].mxu1 %v10803_v22  ;;  %8966 = vmatprep.subr.mxu0 %v10488_v9 }
 0x36f   : > { %8811 = vmatpush3.msra.mxu1 %v10466_v19  ;;  %8952 = vmatmul.mubr.f32.gmra.mrb[14].mxu0 %v10806_v57 }
 0x370   : > { %8812 = vmatprep.mubr.f32.mxu1 %v11654_v0  ;;  %8968 = vmatprep.mubr.f32.mxu0 %v11655_v1 }
 0x371   : > { %9369 = vmatprep.subr.bf16.mxu1 %v11656_v5  ;;  %8967 = vmatpush3.msra.mxu0 %v10488_v9 }
 0x372   : > { %8813 = vmatmul.mubr.f32.vlgmr.msra.gmra.mrb[24].mxu1 %v11657_v7  ;;  %9441 = vmatprep.subr.bf16.mxu0 %v11658_v29 }
 0x373   : > { %9371 = vmatpush3.bf16.msra.mxu1 %v11656_v5  ;;  %8969 = vmatmul.mubr.f32.vlgmr.msra.gmra.mrb[8].mxu0 %v11659_v41 }
 0x374   : > { %8815 = vmatprep.mubr.f32.mxu1 %v11660_v47  ;;  %8971 = vmatprep.mubr.f32.mxu0 %v11661_v48 }
 0x375   : > { %9373 = vmatprep.subr.bf16.mxu1 %v11662_v20  ;;  %9443 = vmatpush3.bf16.msra.mxu0 %v11658_v29 }
 0x376   : > { %8816 = vmatmul.mubr.f32.gmra.mrb[26].mxu1 %v11663_v31  ;;  %9445 = vmatprep.subr.bf16.mxu0 %v11664_v55 }
 0x377   : > { %9375 = vmatpush3.bf16.msra.mxu1 %v11662_v20  ;;  %8972 = vmatmul.mubr.f32.gmra.mrb[10].mxu0 %v11665_v4 }
 0x378   : > { %8818 = vmatprep.mubr.f32.mxu1 %v11666_v45  ;;  %8974 = vmatprep.mubr.f32.mxu0 %v11667_v13 }
 0x379   : > { %9377 = vmatprep.subr.bf16.mxu1 %v11668_v44  ;;  %9447 = vmatpush3.bf16.msra.mxu0 %v11664_v55 }
 0x37a   : > { %8819 = vmatmul.mubr.f32.gmra.mrb[28].mxu1 %v11669_v56  ;;  %9449 = vmatprep.subr.bf16.mxu0 %v11670_v39 }
 0x37b   : > { %9379 = vmatpush3.bf16.msra.mxu1 %v11668_v44  ;;  %8975 = vmatmul.mubr.f32.gmra.mrb[12].mxu0 %v11671_v30 }
 0x37c   : > { %8821 = vmatprep.mubr.f32.mxu1 %v2660_v15  ;;  %8977 = vmatprep.mubr.f32.mxu0 %v3524_v60 }
 0x37d   : > { %8836 = vmatprep.subr.mxu1 %v11672_v25  ;;  %9451 = vmatpush3.bf16.msra.mxu0 %v11670_v39 }
 0x37e   : > { %8822 = vmatmul.mubr.f32.gmra.mrb[30].mxu1 %v2670_v27  ;;  %8992 = vmatprep.subr.mxu0 %v11673_v21 }
 0x37f   : > { %8837 = vmatpush3.msra.mxu1 %v11672_v25  ;;  %8978 = vmatmul.mubr.f32.gmra.mrb[14].mxu0 %v3534_v11 }
 0x380   : > { %8838 = vmatprep.mubr.f32.mxu1 %v10624_v16  ;;  %8994 = vmatprep.mubr.f32.mxu0 %v10626_v34 }
 0x381   : > { %9381 = vmatprep.subr.bf16.mxu1 %v10408_v59  ;;  %8993 = vmatpush3.msra.mxu0 %v11673_v21 }
 0x382   : > { %8839 = vmatmul.mubr.f32.vlgmr.msra.gmra.mrb[24].mxu1 %v10640_v23  ;;  %9453 = vmatprep.subr.bf16.mxu0 %v10428_v2 }
 0x383   : > { %9383 = vmatpush3.bf16.msra.mxu1 %v10408_v59  ;;  %8995 = vmatmul.mubr.f32.vlgmr.msra.gmra.mrb[8].mxu0 %v10642_v46  ;;  %v11674_v59 = vmov 0.0  }
 0x384   : > { %8841 = vmatprep.mubr.f32.mxu1 %v10656_v40  ;;  %8997 = vmatprep.mubr.f32.mxu0 %v10658_v52 }
 0x385   : > { %9455 = vmatpush3.bf16.msra.mxu0 %v10428_v2  ;;  %9385 = vmatprep.subr.bf16.mxu1 %v10430_v3  ;;  %v11675_v2 = vld [vmem:[#allocation14_spill] sm:$0xff] }
 0x386   : > { %8842 = vmatmul.mubr.f32.gmra.mrb[26].mxu1 %v10676_v38  ;;  %9457 = vmatprep.subr.bf16.mxu0 %v10439_v6 }
 0x387   : > { %9387 = vmatpush3.bf16.msra.mxu1 %v10430_v3  ;;  %8998 = vmatmul.mubr.f32.gmra.mrb[10].mxu0 %v10678_v49  ;;  %v10964_v3 = vand.u32 4294901760, %v11675_v2 }
 0x388   : > { %8844 = vmatprep.mubr.f32.mxu1 %v10704_v35  ;;  %9000 = vmatprep.mubr.f32.mxu0 %v10722_v33 }
 0x389   : > { %9459 = vmatpush3.bf16.msra.mxu0 %v10439_v6  ;;  %9389 = vmatprep.subr.bf16.mxu1 %v10448_v8  ;;  %v11676_v6 = vld [vmem:[#allocation16_spill] sm:$0xff]  ;;  %v11087_v48 = vsub.f32 %v11675_v2, %v10964_v3 }
 0x38a   : > { %8845 = vmatmul.mubr.f32.gmra.mrb[28].mxu1 %v10735_v58  ;;  %9461 = vmatprep.subr.bf16.mxu0 %v10455_v17 }
 0x38b   : > { %9391 = vmatpush3.bf16.msra.mxu1 %v10448_v8  ;;  %9001 = vmatmul.mubr.f32.gmra.mrb[12].mxu0 %v10737_v50  ;;  %v10969_v8 = vand.u32 4294901760, %v11676_v6  ;;  %v4353_v13 = vand.u32 4294901760, %v11087_v48 }
 0x38c   : > { %8847 = vmatprep.mubr.f32.mxu1 %v10747_v43  ;;  %9003 = vmatprep.mubr.f32.mxu0 %v10749_v37 }
 0x38d   : > { %9463 = vmatpush3.bf16.msra.mxu0 %v10455_v17  ;;  %8862 = vmatprep.subr.mxu1 %v10466_v19  ;;  %v4354_v21 = vsub.f32 %v11087_v48, %v4353_v13  ;;  %v11114_v2 = vsub.f32 %v11676_v6, %v10969_v8 }
 0x38e   : > { %8848 = vmatmul.mubr.f32.gmra.mrb[30].mxu1 %v10796_v53  ;;  %9018 = vmatprep.subr.mxu0 %v10488_v9 }
 0x38f   : > { %8863 = vmatpush3.msra.mxu1 %v10466_v19  ;;  %9004 = vmatmul.mubr.f32.gmra.mrb[14].mxu0 %v10800_v18  ;;  %v5251_v6 = vand.u32 4294901760, %v11114_v2 }
 0x390   : > { %8864 = vmatprep.mubr.f32.mxu1 %v10624_v16  ;;  %9020 = vmatprep.mubr.f32.mxu0 %v10626_v34 }
 0x391   : > { %9019 = vmatpush3.msra.mxu0 %v10488_v9  ;;  %9032 = vmatprep.subr.mxu1 %v11674_v59 }
 0x392   : > { %9092 = vmatprep.subr.mxu0 %v11674_v59  ;;  %8865 = vmatmul.mubr.f32.vlgmr.msra.gmra.mrb[24].mxu1 %v10640_v23 }
 0x393   : > { %9021 = vmatmul.mubr.f32.vlgmr.msra.gmra.mrb[8].mxu0 %v10642_v46  ;;  %9033 = vmatpush3.msra.mxu1 %v10964_v3 }
 0x394   : > { %9093 = vmatpush3.msra.mxu0 %v10969_v8  ;;  %8867 = vmatprep.mubr.f32.mxu1 %v10656_v40 }
 0x395   : > { %9023 = vmatprep.mubr.f32.mxu0 %v10658_v52  ;;  %9037 = vmatprep.subr.mxu1 %v11674_v59 }
 0x396   : > { %8868 = vmatmul.mubr.f32.gmra.mrb[26].mxu1 %v10676_v38  ;;  %9097 = vmatprep.subr.mxu0 %v11674_v59 }
 0x397   : > { %9024 = vmatmul.mubr.f32.gmra.mrb[10].mxu0 %v10678_v49  ;;  %8870 = vmatprep.mubr.f32.mxu1 %v10704_v35 }
 0x398   : > { %9026 = vmatprep.mubr.f32.mxu0 %v10722_v33 }
 0x39a   : > { %8871 = vmatmul.mubr.f32.gmra.mrb[28].mxu1 %v10735_v58 }
 0x39b   : > { %9027 = vmatmul.mubr.f32.gmra.mrb[12].mxu0 %v10737_v50  ;;  %8873 = vmatprep.mubr.f32.mxu1 %v10747_v43 }
 0x39c   : > { %9029 = vmatprep.mubr.f32.mxu0 %v10749_v37 }
 0x39e   : > { %8874 = vmatmul.mubr.f32.gmra.mrb[30].mxu1 %v10796_v53 }
 0x39f   : > { %9030 = vmatmul.mubr.f32.gmra.mrb[14].mxu0 %v10800_v18  ;;  %9034 = vmatprep.mubr.msk.f32.mxu1 %vm9908_vm2, %v11674_v59 }
 0x3a0   : > { %9094 = vmatprep.mubr.msk.f32.mxu0 %vm9908_vm2, %v11674_v59 }
 0x465   : > { %v10998_v40 = vpop.f32.mrb[24].mxu1 }
 0x466   : > { %7880 = vst.msk [vmem:[%s11001_s17 + $0x8] sm:$0xff] %vm1436_vm10, %v10998_v40  ;;  %v9022_v52 = vpop.f32.mrb[8].mxu0  ;;  %v11006_v17 = vpop.f32.mrb[25].mxu1  ;;  %v4234_v58 = vsel %vm1436_vm10, %v10998_v40, 0.0 }
 0x467   : > { %v4216_v19 = vadd.f32 %v9022_v52, %v10998_v40  ;;  %7879 = vst.msk [vmem:[%s11001_s17] sm:$0xff] %vm1436_vm10, %v11006_v17  ;;  %v4169_v9 = vpop.f32.mrb[9].mxu0  ;;  %v4231_v53 = vsel %vm1436_vm10, %v11006_v17, 0.0 }
 0x468   : > { %v4215_v16 = vadd.f32 %v4169_v9, %v11006_v17  ;;  %4232 = vadd.xlane.f32.xlu1 %v4231_v53 }
 0x469   : > { %v4224_v34 = vmul.f32 0.5, %v4216_v19  ;;  %v11015_v23 = vpop.f32.mrb[26].mxu1 }
 0x46a   : > { %v4223_v46 = vmul.f32 0.5, %v4215_v16  ;;  %7882 = vst.msk [vmem:[%s11001_s17 + $0x18] sm:$0xff] %vm1436_vm10, %v11015_v23  ;;  %v9025_v38 = vpop.f32.mrb[10].mxu0  ;;  %v11020_v49 = vpop.f32.mrb[27].mxu1  ;;  %v4240_v57 = vsel %vm1436_vm10, %v11015_v23, 0.0 }
 0x46b   : > { %7888 = vst.msk [vmem:[%s11023_s21 + $0x8] sm:$0xff] %vm1436_vm10, %v4224_v34  ;;  %v4218_v35 = vadd.f32 %v9025_v38, %v11015_v23  ;;  %7881 = vst.msk [vmem:[%s11001_s17 + $0x10] sm:$0xff] %vm1436_vm10, %v11020_v49  ;;  %v4181_v33 = vpop.f32.mrb[11].mxu0  ;;  %v4237_v60 = vsel %vm1436_vm10, %v11020_v49, 0.0  ;;  %v4355_v34 = vand.u32 4294901760, %v4354_v21 }
 0x46c   : > { %7887 = vst.msk [vmem:[%s11023_s21] sm:$0xff] %vm1436_vm10, %v4223_v46  ;;  %v4217_v50 = vadd.f32 %v4181_v33, %v11020_v49  ;;  %4235 = vadd.xlane.f32.xlu1 %v4234_v58  ;;  %v5252_v33 = vsub.f32 %v11114_v2, %v5251_v6 }
 0x46d   : > { %v4226_v43 = vmul.f32 0.5, %v4218_v35  ;;  %v11036_v37 = vpop.f32.mrb[28].mxu1 }
 0x46e   : > { %v4225_v63 = vmul.f32 0.5, %v4217_v50  ;;  %7884 = vst.msk [vmem:[%s11001_s17 + $0x28] sm:$0xff] %vm1436_vm10, %v11036_v37  ;;  %v9028_v26 = vpop.f32.mrb[12].mxu0  ;;  %v11041_v28 = vpop.f32.mrb[29].mxu1  ;;  %v4246_v32 = vsel %vm1436_vm10, %v11036_v37, 0.0 }
 0x46f   : > { %7890 = vst.msk [vmem:[%s11023_s21 + $0x18] sm:$0xff] %vm1436_vm10, %v4226_v43  ;;  %v4220_v61 = vadd.f32 %v9028_v26, %v11036_v37  ;;  %7883 = vst.msk [vmem:[%s11001_s17 + $0x20] sm:$0xff] %vm1436_vm10, %v11041_v28  ;;  %v4193_v15 = vpop.f32.mrb[13].mxu0  ;;  %v4243_v62 = vsel %vm1436_vm10, %v11041_v28, 0.0  ;;  %v5253_v26 = vand.u32 4294901760, %v5252_v33 }
 0x470   : > { %7889 = vst.msk [vmem:[%s11023_s21 + $0x10] sm:$0xff] %vm1436_vm10, %v4225_v63  ;;  %v4219_v12 = vadd.f32 %v4193_v15, %v11041_v28  ;;  %4238 = vadd.xlane.f32.xlu1 %v4237_v60 }
 0x471   : > { %v4228_v51 = vmul.f32 0.5, %v4220_v61  ;;  %v11054_v36 = vpop.f32.mrb[30].mxu1 }
 0x472   : > { %v4227_v42 = vmul.f32 0.5, %v4219_v12  ;;  %7886 = vst.msk [vmem:[%s11001_s17 + $0x38] sm:$0xff] %vm1436_vm10, %v11054_v36  ;;  %v9031_v14 = vpop.f32.mrb[14].mxu0  ;;  %v11059_v10 = vpop.f32.mrb[31].mxu1  ;;  %v4252_v0 = vsel %vm1436_vm10, %v11054_v36, 0.0 }
 0x473   : > { %7892 = vst.msk [vmem:[%s11023_s21 + $0x28] sm:$0xff] %vm1436_vm10, %v4228_v51  ;;  %v4222_v18 = vadd.f32 %v9031_v14, %v11054_v36  ;;  %7885 = vst.msk [vmem:[%s11001_s17 + $0x30] sm:$0xff] %vm1436_vm10, %v11059_v10  ;;  %v4205_v22 = vpop.f32.mrb[15].mxu0  ;;  %v4249_v54 = vsel %vm1436_vm10, %v11059_v10, 0.0  ;;  %v11677_v51 = vld [vmem:[#allocation13_spill] sm:$0xff]  ;;  %s9757_s17 = scalar_lea.vmem %s9756_s16, 2048 }
 0x474   : > { %7891 = vst.msk [vmem:[%s11023_s21 + $0x20] sm:$0xff] %vm1436_vm10, %v4227_v42  ;;  %v4221_v27 = vadd.f32 %v4205_v22, %v11059_v10  ;;  %4241 = vadd.xlane.f32.xlu1 %v4240_v57 }
 0x475   : > { %v4230_v11 = vmul.f32 0.5, %v4222_v18 }
 0x476   : > { %v4229_v24 = vmul.f32 0.5, %v4221_v27  ;;  %v11678_v27 = vld [vmem:[#allocation18_spill] sm:$0xff] }
 0x477   : > { %7894 = vst.msk [vmem:[%s11023_s21 + $0x38] sm:$0xff] %vm1436_vm10, %v4230_v11  ;;  %v11204_v11 = vand.u32 4294901760, %v11678_v27 }
 0x478   : > { %7893 = vst.msk [vmem:[%s11023_s21 + $0x30] sm:$0xff] %vm1436_vm10, %v4229_v24  ;;  %4244 = vadd.xlane.f32.xlu1 %v4243_v62  ;;  %s9751_s21 = scalar_lea.vmem %s11399_s2, 1024 }
 0x479   : > { %p9752_p11 = scmp.ne.s32.totalorder %s11399_s2, %s9751_s21  ;;  %p9759_p1 = scmp.lt.s32.totalorder %s9757_s17, %s9751_s21 }
 0x47b   : > { %p9753_p12 = pnand %p9752_p11, %p10030_p5  ;;  %p9760_p2 = por %p9759_p1, %p9758_p0 }
 0x47c   : > { %4247 = vadd.xlane.f32.xlu1 %v4246_v32  ;;  %v6148_v32 = vsub.f32 %v11678_v27, %v11204_v11 }
 0x47d   : > { %p9754_p13 = pneg %p9753_p12 }
 0x47f   : > { %p9761_p3 = pnand %p9760_p2, %p9754_p13 }
 0x480   : > { %4250 = vadd.xlane.f32.xlu1 %v4249_v54 }
 0x484   : > { %4253 = vadd.xlane.f32.xlu1 %v4252_v0 }
 0x4f5   : > { %v4233_v1 = vpop.xlane.xlu1 %4232 }
 0x4f6   : > { %9735 = vrcp.f32 %v4233_v1 }
 0x4f9   : > { %v4236_v5 = vpop.xlane.xlu1 %4235 }
 0x4fa   : > { %9737 = vrcp.f32 %v4236_v5  ;;  %v6149_v5 = vand.u32 4294901760, %v6148_v32 }
 0x4fd   : > { %v4239_v7 = vpop.xlane.xlu1 %4238 }
 0x4fe   : > { %9739 = vrcp.f32 %v4239_v7  ;;  %v6150_v7 = vsub.f32 %v6148_v32, %v6149_v5 }
 0x500   : > { %v9736_v29 = vpop.eup %9735 }
 0x501   : > { %v4256_v41 = vmul.f32 %v9736_v29, %v11006_v17  ;;  %v4242_v47 = vpop.xlane.xlu1 %4241 }
 0x502   : > { %9741 = vrcp.f32 %v4242_v47 }
 0x503   : > { %v4272_v20 = vsel %vm1436_vm10, %v4256_v41, 0  ;;  %7895 = vst.msk [vmem:[%s11091_s22] sm:$0xff] %vm1436_vm10, %v4256_v41  ;;  %v6151_v41 = vand.u32 4294901760, %v6150_v7 }
 0x504   : > { %v9738_v31 = vpop.eup %9737  ;;  %v11095_v55 = vand.u32 4294901760, %v4272_v20 }
 0x505   : > { %v11098_v4 = vmul.f32 %v9738_v31, %v10998_v40  ;;  %v4245_v45 = vpop.xlane.xlu1 %4244 }
 0x506   : > { %v11102_v44 = vsub.f32 %v4272_v20, %v11095_v55  ;;  %9743 = vrcp.f32 %v4245_v45  ;;  %v11679_v20 = vld [vmem:[#allocation15_spill] sm:$0xff] }
 0x507   : > { %7896 = vst.msk [vmem:[%s11091_s22 + $0x8] sm:$0xff] %vm1436_vm10, %v11098_v4  ;;  %v4721_v60 = vsel %vm1436_vm10, %v11098_v4, 0  ;;  %v11254_v31 = vand.u32 4294901760, %v11679_v20 }
 0x508   : > { %v9740_v56 = vpop.eup %9739  ;;  %v4342_v39 = vand.u32 4294901760, %v11102_v44  ;;  %v11181_v12 = vand.u32 4294901760, %v4721_v60 }
 0x509   : > { %v4260_v30 = vmul.f32 %v9740_v56, %v11020_v49  ;;  %v4248_v25 = vpop.xlane.xlu1 %4247  ;;  %v5699_v4 = vsub.f32 %v11679_v20, %v11254_v31 }
 0x50a   : > { %9745 = vrcp.f32 %v4248_v25  ;;  %v4343_v40 = vsub.f32 %v11102_v44, %v4342_v39  ;;  %v4790_v42 = vsub.f32 %v4721_v60, %v11181_v12  ;;  %v11682_v60 = vld [vmem:[#allocation19_spill] sm:$0xff] }
 0x50b   : > { %v5170_v52 = vsel %vm1436_vm10, %v4260_v30, 0  ;;  %7897 = vst.msk [vmem:[%s11091_s22 + $0x10] sm:$0xff] %vm1436_vm10, %v4260_v30  ;;  %v5700_v56 = vand.u32 4294901760, %v5699_v4 }
 0x50c   : > { %v9742_v17 = vpop.eup %9741  ;;  %v11120_v19 = vand.u32 4294901760, %v5170_v52  ;;  %v4344_v9 = vand.u32 4294901760, %v4343_v40  ;;  %v4791_v18 = vand.u32 4294901760, %v4790_v42 }
 0x50d   : > { %v11123_v53 = vmul.f32 %v9742_v17, %v11015_v23  ;;  %v4251_v16 = vpop.xlane.xlu1 %4250 }
 0x50e   : > { %v5239_v46 = vsub.f32 %v5170_v52, %v11120_v19  ;;  %9747 = vrcp.f32 %v4251_v16  ;;  %9035 = vmatmul.mubr.f32.vlgmr.msra.gmra.mrb[32].mxu1 %v4344_v9  ;;  %v4792_v24 = vsub.f32 %v4790_v42, %v4791_v18 }
 0x50f   : > { %7898 = vst.msk [vmem:[%s11091_s22 + $0x18] sm:$0xff] %vm1436_vm10, %v11123_v53  ;;  %9038 = vmatpush3.msra.mxu1 %v4355_v34  ;;  %9039 = vmatprep.mubr.msk.f32.mxu1 %vm9908_vm2, %v11674_v59  ;;  %v5619_v47 = vsel %vm1436_vm10, %v11123_v53, 0 }
 0x510   : > { %v9744_v38 = vpop.eup %9743  ;;  %9042 = vmatprep.subr.mxu1 %v11674_v59  ;;  %v5240_v23 = vand.u32 4294901760, %v5239_v46  ;;  %v4793_v54 = vand.u32 4294901760, %v4792_v24 }
 0x511   : > { %v4264_v49 = vmul.f32 %v9744_v38, %v11041_v28  ;;  %v4254_v35 = vpop.xlane.xlu1 %4253 }
 0x512   : > { %9749 = vrcp.f32 %v4254_v35  ;;  %v5241_v58 = vsub.f32 %v5239_v46, %v5240_v23 }
 0x513   : > { %7899 = vst.msk [vmem:[%s11091_s22 + $0x20] sm:$0xff] %vm1436_vm10, %v4264_v49 }
 0x514   : > { %v9746_v50 = vpop.eup %9745  ;;  %v5242_v43 = vand.u32 4294901760, %v5241_v58 }
 0x515   : > { %v11138_v63 = vmul.f32 %v9746_v50, %v11036_v37 }
 0x516   : > { %9040 = vmatmul.mubr.f32.vlgmr.msra.gmra.mrb[32].mxu1 %v11095_v55  ;;  %9095 = vmatmul.mubr.f32.vlgmr.msra.gmra.mrb[16].mxu0 %v5242_v43 }
 0x517   : > { %7900 = vst.msk [vmem:[%s11091_s22 + $0x28] sm:$0xff] %vm1436_vm10, %v11138_v63  ;;  %9043 = vmatpush3.msra.mxu1 %v11087_v48  ;;  %9098 = vmatpush3.msra.mxu0 %v5253_v26  ;;  %v11248_v48 = vand.u32 4294901760, %v5619_v47 }
 0x518   : > { %v9748_v28 = vpop.eup %9747  ;;  %9044 = vmatprep.mubr.msk.f32.mxu1 %vm9908_vm2, %v11674_v59  ;;  %9047 = vmatprep.subr.mxu1 %v11674_v59 }
 0x519   : > { %v11149_v37 = vmul.f32 %v9748_v28, %v11059_v10  ;;  %9099 = vmatprep.mubr.msk.f32.mxu0 %vm9908_vm2, %v11674_v59  ;;  %9102 = vmatprep.subr.mxu0 %v11674_v59  ;;  %v6068_v10 = vsel %vm1436_vm10, %v4264_v49, 0 }
 0x51a   : > { %v11198_v22 = vand.u32 4294901760, %v6068_v10 }
 0x51b   : > { %7901 = vst.msk [vmem:[%s11091_s22 + $0x30] sm:$0xff] %vm1436_vm10, %v11149_v37  ;;  %v6966_v45 = vsel %vm1436_vm10, %v11149_v37, 0 }
 0x51c   : > { %v9750_v61 = vpop.eup %9749 }
 0x51d   : > { %v11158_v15 = vmul.f32 %v9750_v61, %v11054_v36  ;;  %v11187_v36 = vand.u32 4294901760, %v11677_v51 }
 0x51e   : > { %9045 = vmatmul.mubr.f32.vlgmr.msra.gmra.mrb[32].mxu1 %v11102_v44  ;;  %9100 = vmatmul.mubr.f32.vlgmr.msra.gmra.mrb[16].mxu0 %v11120_v19  ;;  %v11266_v44 = vand.u32 4294901760, %v6966_v45 }
 0x51f   : > { %7902 = vst.msk [vmem:[%s11091_s22 + $0x38] sm:$0xff] %vm1436_vm10, %v11158_v15  ;;  %9048 = vmatpush3.msra.mxu1 %v10964_v3  ;;  %9103 = vmatpush3.msra.mxu0 %v11114_v2  ;;  %v4801_v14 = vsub.f32 %v11677_v51, %v11187_v36  ;;  %v5701_v2 = vsub.f32 %v5699_v4, %v5700_v56  ;;  %v7415_v37 = vsel %vm1436_vm10, %v11158_v15, 0 }
 0x520   : > { %9049 = vmatprep.mubr.msk.f32.mxu1 %vm9908_vm2, %v11674_v59  ;;  %9052 = vmatprep.subr.mxu1 %v11674_v59  ;;  %v7035_v21 = vsub.f32 %v6966_v45, %v11266_v44  ;;  %v7483_v61 = vand.u32 4294901760, %v7415_v37 }
 0x521   : > { %9104 = vmatprep.mubr.msk.f32.mxu0 %vm9908_vm2, %v11674_v59  ;;  %9107 = vmatprep.subr.mxu0 %v11674_v59  ;;  %v4802_v57 = vand.u32 4294901760, %v4801_v14 }
 0x522   : > { %v7036_v17 = vand.u32 4294901760, %v7035_v21  ;;  %v7484_v51 = vsub.f32 %v7415_v37, %v7483_v61 }
 0x523   : > { %v4803_v62 = vsub.f32 %v4801_v14, %v4802_v57 }
 0x524   : > { %v7037_v53 = vsub.f32 %v7035_v21, %v7036_v17  ;;  %v7485_v15 = vand.u32 4294901760, %v7484_v51 }
 0x525   : > { %v4804_v1 = vand.u32 4294901760, %v4803_v62 }
 0x526   : > { %9050 = vmatmul.mubr.f32.vlgmr.msra.gmra.mrb[32].mxu1 %v4342_v39  ;;  %9105 = vmatmul.mubr.f32.vlgmr.msra.gmra.mrb[16].mxu0 %v5239_v46  ;;  %v11680_v39 = vld [vmem:[#allocation20_spill] sm:$0xff]  ;;  %v7038_v34 = vand.u32 4294901760, %v7037_v53  ;;  %v6517_v46 = vsel %vm1436_vm10, %v11138_v63, 0 }
 0x527   : > { %9053 = vmatpush3.msra.mxu1 %v4353_v13  ;;  %9108 = vmatpush3.msra.mxu0 %v10969_v8  ;;  %v11272_v30 = vand.u32 4294901760, %v11680_v39  ;;  %v6585_v38 = vand.u32 4294901760, %v6517_v46 }
 0x528   : > { %9054 = vmatprep.mubr.msk.f32.mxu1 %vm9908_vm2, %v11674_v59  ;;  %9057 = vmatprep.subr.mxu1 %v11674_v59 }
 0x529   : > { %9109 = vmatprep.mubr.msk.f32.mxu0 %vm9908_vm2, %v11674_v59  ;;  %9112 = vmatprep.subr.mxu0 %v11674_v59  ;;  %v7046_v40 = vsub.f32 %v11680_v39, %v11272_v30  ;;  %v6586_v35 = vsub.f32 %v6517_v46, %v6585_v38 }
 0x52b   : > { %v7047_v9 = vand.u32 4294901760, %v7046_v40  ;;  %v6587_v58 = vand.u32 4294901760, %v6586_v35 }
 0x52d   : > { %v7048_v16 = vsub.f32 %v7046_v40, %v7047_v9  ;;  %v6588_v43 = vsub.f32 %v6586_v35, %v6587_v58 }
 0x52e   : > { %9055 = vmatmul.mubr.f32.vlgmr.msra.gmra.mrb[32].mxu1 %v11095_v55  ;;  %9110 = vmatmul.mubr.f32.vlgmr.msra.gmra.mrb[16].mxu0 %v5240_v23  ;;  %v11681_v23 = vld [vmem:[#allocation17_spill] sm:$0xff] }
 0x52f   : > { %9058 = vmatpush3.msra.mxu1 %v10964_v3  ;;  %9113 = vmatpush3.msra.mxu0 %v5251_v6  ;;  %v6137_v3 = vsub.f32 %v6068_v10, %v11198_v22  ;;  %v7049_v6 = vand.u32 4294901760, %v7048_v16  ;;  %v6520_v49 = vand.u32 4294901760, %v11681_v23  ;;  %v6589_v26 = vand.u32 4294901760, %v6588_v43 }
 0x530   : > { %9059 = vmatprep.mubr.msk.f32.mxu1 %vm9908_vm2, %v11674_v59  ;;  %9062 = vmatprep.subr.mxu1 %v11674_v59 }
 0x531   : > { %9114 = vmatprep.mubr.msk.f32.mxu0 %vm9908_vm2, %v11674_v59  ;;  %9117 = vmatprep.subr.mxu0 %v11674_v59  ;;  %v6138_v0 = vand.u32 4294901760, %v6137_v3  ;;  %v6597_v33 = vsub.f32 %v11681_v23, %v6520_v49 }
 0x533   : > { %v6598_v50 = vand.u32 4294901760, %v6597_v33 }
 0x535   : > { %v6599_v63 = vsub.f32 %v6597_v33, %v6598_v50 }
 0x536   : > { %9060 = vmatmul.mubr.f32.vlgmr.msra.gmra.mrb[32].mxu1 %v11095_v55  ;;  %9115 = vmatmul.mubr.f32.vlgmr.msra.gmra.mrb[16].mxu0 %v11120_v19  ;;  %v5688_v55 = vsub.f32 %v5619_v47, %v11248_v48 }
 0x537   : > { %9063 = vmatpush3.msra.mxu1 %v11187_v36  ;;  %9118 = vmatpush3.msra.mxu0 %v10969_v8  ;;  %v6139_v8 = vsub.f32 %v6137_v3, %v6138_v0  ;;  %v6600_v28 = vand.u32 4294901760, %v6599_v63 }
 0x538   : > { %9064 = vmatprep.mubr.msk.f32.mxu1 %vm9908_vm2, %v11674_v59  ;;  %9067 = vmatprep.subr.mxu1 %v11674_v59  ;;  %v5689_v13 = vand.u32 4294901760, %v5688_v55 }
 0x539   : > { %9119 = vmatprep.mubr.msk.f32.mxu0 %vm9908_vm2, %v11674_v59  ;;  %9152 = vmatprep.subr.mxu0 %v11674_v59  ;;  %v6140_v29 = vand.u32 4294901760, %v6139_v8 }
 0x53a   : > { %9065 = vmatmul.mubr.f32.vlgmr.msra.gmra.mrb[34].mxu1 %v4793_v54  ;;  %v5690_v25 = vsub.f32 %v5688_v55, %v5689_v13 }
 0x53b   : > { %9068 = vmatpush3.msra.mxu1 %v4804_v1  ;;  %9069 = vmatprep.mubr.msk.f32.mxu1 %vm9908_vm2, %v11674_v59 }
 0x53c   : > { %9072 = vmatprep.subr.mxu1 %v11674_v59  ;;  %v5691_v52 = vand.u32 4294901760, %v5690_v25 }
 0x53e   : > { %9120 = vmatmul.mubr.f32.vlgmr.msra.gmra.mrb[16].mxu0 %v11120_v19  ;;  %v5702_v19 = vand.u32 4294901760, %v5701_v2 }
 0x53f   : > { %9153 = vmatpush3.msra.mxu0 %v11204_v11  ;;  %9154 = vmatprep.mubr.msk.f32.mxu0 %vm9908_vm2, %v11674_v59 }
 0x540   : > { %9157 = vmatprep.subr.mxu0 %v11674_v59 }
 0x542   : > { %9070 = vmatmul.mubr.f32.vlgmr.msra.gmra.mrb[34].mxu1 %v11181_v12  ;;  %9155 = vmatmul.mubr.f32.vlgmr.msra.gmra.mrb[18].mxu0 %v6140_v29 }
 0x543   : > { %9073 = vmatpush3.msra.mxu1 %v4801_v14  ;;  %9158 = vmatpush3.msra.mxu0 %v6151_v41  ;;  %v7486_v14 = vsub.f32 %v7484_v51, %v7485_v15 }
 0x544   : > { %9074 = vmatprep.mubr.msk.f32.mxu1 %vm9908_vm2, %v11674_v59  ;;  %9077 = vmatprep.subr.mxu1 %v11674_v59 }
 0x545   : > { %9159 = vmatprep.mubr.msk.f32.mxu0 %vm9908_vm2, %v11674_v59  ;;  %9162 = vmatprep.subr.mxu0 %v11674_v59 }
 0x54a   : > { %9075 = vmatmul.mubr.f32.vlgmr.msra.gmra.mrb[34].mxu1 %v4790_v42  ;;  %9160 = vmatmul.mubr.f32.vlgmr.msra.gmra.mrb[18].mxu0 %v11198_v22 }
 0x54b   : > { %9078 = vmatpush3.msra.mxu1 %v11187_v36  ;;  %9163 = vmatpush3.msra.mxu0 %v6148_v32 }
 0x54c   : > { %9079 = vmatprep.mubr.msk.f32.mxu1 %vm9908_vm2, %v11674_v59  ;;  %9082 = vmatprep.subr.mxu1 %v11674_v59 }
 0x54d   : > { %9164 = vmatprep.mubr.msk.f32.mxu0 %vm9908_vm2, %v11674_v59  ;;  %9167 = vmatprep.subr.mxu0 %v11674_v59 }
 0x552   : > { %9080 = vmatmul.mubr.f32.vlgmr.msra.gmra.mrb[34].mxu1 %v4791_v18  ;;  %9165 = vmatmul.mubr.f32.vlgmr.msra.gmra.mrb[18].mxu0 %v6137_v3  ;;  %v7487_v18 = vand.u32 4294901760, %v7486_v14 }
 0x553   : > { %9083 = vmatpush3.msra.mxu1 %v4802_v57  ;;  %9168 = vmatpush3.msra.mxu0 %v11204_v11 }
 0x554   : > { %9084 = vmatprep.mubr.msk.f32.mxu1 %vm9908_vm2, %v11674_v59  ;;  %9087 = vmatprep.subr.mxu1 %v11674_v59 }
 0x555   : > { %9169 = vmatprep.mubr.msk.f32.mxu0 %vm9908_vm2, %v11674_v59  ;;  %9172 = vmatprep.subr.mxu0 %v11674_v59 }
 0x55a   : > { %9085 = vmatmul.mubr.f32.vlgmr.msra.gmra.mrb[34].mxu1 %v11181_v12  ;;  %9170 = vmatmul.mubr.f32.vlgmr.msra.gmra.mrb[18].mxu0 %v6138_v0 }
 0x55b   : > { %9088 = vmatpush3.msra.mxu1 %v11187_v36  ;;  %9173 = vmatpush3.msra.mxu0 %v6149_v5 }
 0x55c   : > { %9089 = vmatprep.mubr.msk.f32.mxu1 %vm9908_vm2, %v11674_v59  ;;  %9122 = vmatprep.subr.mxu1 %v11674_v59 }
 0x55d   : > { %9174 = vmatprep.mubr.msk.f32.mxu0 %vm9908_vm2, %v11674_v59  ;;  %9177 = vmatprep.subr.mxu0 %v11674_v59 }
 0x562   : > { %9090 = vmatmul.mubr.f32.vlgmr.msra.gmra.mrb[34].mxu1 %v11181_v12  ;;  %9175 = vmatmul.mubr.f32.vlgmr.msra.gmra.mrb[18].mxu0 %v11198_v22  ;;  %v7418_v12 = vand.u32 4294901760, %v11682_v60 }
 0x563   : > { %9123 = vmatpush3.msra.mxu1 %v11254_v31  ;;  %9178 = vmatpush3.msra.mxu0 %v11204_v11 }
 0x564   : > { %9124 = vmatprep.mubr.msk.f32.mxu1 %vm9908_vm2, %v11674_v59  ;;  %9127 = vmatprep.subr.mxu1 %v11674_v59  ;;  %v7495_v36 = vsub.f32 %v11682_v60, %v7418_v12 }
 0x565   : > { %9179 = vmatprep.mubr.msk.f32.mxu0 %vm9908_vm2, %v11674_v59  ;;  %9212 = vmatprep.subr.mxu0 %v11674_v59 }
 0x566   : > { %9125 = vmatmul.mubr.f32.vlgmr.msra.gmra.mrb[36].mxu1 %v5691_v52  ;;  %v7496_v42 = vand.u32 4294901760, %v7495_v36 }
 0x567   : > { %9128 = vmatpush3.msra.mxu1 %v5702_v19  ;;  %9129 = vmatprep.mubr.msk.f32.mxu1 %vm9908_vm2, %v11674_v59 }
 0x568   : > { %9132 = vmatprep.subr.mxu1 %v11674_v59  ;;  %v7497_v10 = vsub.f32 %v7495_v36, %v7496_v42 }
 0x56a   : > { %9180 = vmatmul.mubr.f32.vlgmr.msra.gmra.mrb[18].mxu0 %v11198_v22  ;;  %v7498_v22 = vand.u32 4294901760, %v7497_v10 }
 0x56b   : > { %9213 = vmatpush3.msra.mxu0 %v11272_v30  ;;  %9214 = vmatprep.mubr.msk.f32.mxu0 %vm9908_vm2, %v11674_v59 }
 0x56c   : > { %9217 = vmatprep.subr.mxu0 %v11674_v59 }
 0x56e   : > { %9130 = vmatmul.mubr.f32.vlgmr.msra.gmra.mrb[36].mxu1 %v11248_v48  ;;  %9215 = vmatmul.mubr.f32.vlgmr.msra.gmra.mrb[20].mxu0 %v7038_v34 }
 0x56f   : > { %9133 = vmatpush3.msra.mxu1 %v5699_v4  ;;  %9218 = vmatpush3.msra.mxu0 %v7049_v6 }
 0x570   : > { %9134 = vmatprep.mubr.msk.f32.mxu1 %vm9908_vm2, %v11674_v59  ;;  %9137 = vmatprep.subr.mxu1 %v11674_v59 }
 0x571   : > { %9219 = vmatprep.mubr.msk.f32.mxu0 %vm9908_vm2, %v11674_v59  ;;  %9222 = vmatprep.subr.mxu0 %v11674_v59 }
 0x576   : > { %9135 = vmatmul.mubr.f32.vlgmr.msra.gmra.mrb[36].mxu1 %v5688_v55  ;;  %9220 = vmatmul.mubr.f32.vlgmr.msra.gmra.mrb[20].mxu0 %v11266_v44 }
 0x577   : > { %9138 = vmatpush3.msra.mxu1 %v11254_v31  ;;  %9223 = vmatpush3.msra.mxu0 %v7046_v40 }
 0x578   : > { %9139 = vmatprep.mubr.msk.f32.mxu1 %vm9908_vm2, %v11674_v59  ;;  %9142 = vmatprep.subr.mxu1 %v11674_v59 }
 0x579   : > { %9224 = vmatprep.mubr.msk.f32.mxu0 %vm9908_vm2, %v11674_v59  ;;  %9227 = vmatprep.subr.mxu0 %v11674_v59 }
 0x57e   : > { %9140 = vmatmul.mubr.f32.vlgmr.msra.gmra.mrb[36].mxu1 %v5689_v13  ;;  %9225 = vmatmul.mubr.f32.vlgmr.msra.gmra.mrb[20].mxu0 %v7035_v21 }
 0x57f   : > { %9143 = vmatpush3.msra.mxu1 %v5700_v56  ;;  %9228 = vmatpush3.msra.mxu0 %v11272_v30 }
 0x580   : > { %9144 = vmatprep.mubr.msk.f32.mxu1 %vm9908_vm2, %v11674_v59  ;;  %9147 = vmatprep.subr.mxu1 %v11674_v59 }
 0x581   : > { %9229 = vmatprep.mubr.msk.f32.mxu0 %vm9908_vm2, %v11674_v59  ;;  %9232 = vmatprep.subr.mxu0 %v11674_v59 }
 0x586   : > { %9145 = vmatmul.mubr.f32.vlgmr.msra.gmra.mrb[36].mxu1 %v11248_v48  ;;  %9230 = vmatmul.mubr.f32.vlgmr.msra.gmra.mrb[20].mxu0 %v7036_v17 }
 0x587   : > { %9148 = vmatpush3.msra.mxu1 %v11254_v31  ;;  %9233 = vmatpush3.msra.mxu0 %v7047_v9 }
 0x588   : > { %9149 = vmatprep.mubr.msk.f32.mxu1 %vm9908_vm2, %v11674_v59  ;;  %9182 = vmatprep.subr.mxu1 %v11674_v59 }
 0x589   : > { %9234 = vmatprep.mubr.msk.f32.mxu0 %vm9908_vm2, %v11674_v59  ;;  %9237 = vmatprep.subr.mxu0 %v11674_v59 }
 0x58e   : > { %9150 = vmatmul.mubr.f32.vlgmr.msra.gmra.mrb[36].mxu1 %v11248_v48  ;;  %9235 = vmatmul.mubr.f32.vlgmr.msra.gmra.mrb[20].mxu0 %v11266_v44 }
 0x58f   : > { %9183 = vmatpush3.msra.mxu1 %v6520_v49  ;;  %9238 = vmatpush3.msra.mxu0 %v11272_v30 }
 0x590   : > { %9184 = vmatprep.mubr.msk.f32.mxu1 %vm9908_vm2, %v11674_v59  ;;  %9187 = vmatprep.subr.mxu1 %v11674_v59 }
 0x591   : > { %9239 = vmatprep.mubr.msk.f32.mxu0 %vm9908_vm2, %v11674_v59 }
 0x592   : > { %9185 = vmatmul.mubr.f32.vlgmr.msra.gmra.mrb[38].mxu1 %v6589_v26 }
 0x593   : > { %9188 = vmatpush3.msra.mxu1 %v6600_v28  ;;  %9189 = vmatprep.mubr.msk.f32.mxu1 %vm9908_vm2, %v11674_v59 }
 0x594   : > { %9192 = vmatprep.subr.mxu1 %v11674_v59 }
 0x596   : > { %9240 = vmatmul.mubr.f32.vlgmr.msra.gmra.mrb[20].mxu0 %v11266_v44 }
 0x59a   : > { %9190 = vmatmul.mubr.f32.vlgmr.msra.gmra.mrb[38].mxu1 %v6585_v38 }
 0x59b   : > { %9193 = vmatpush3.msra.mxu1 %v6597_v33  ;;  %9194 = vmatprep.mubr.msk.f32.mxu1 %vm9908_vm2, %v11674_v59 }
 0x59c   : > { %9197 = vmatprep.subr.mxu1 %v11674_v59 }
 0x5a2   : > { %9195 = vmatmul.mubr.f32.vlgmr.msra.gmra.mrb[38].mxu1 %v6586_v35 }
 0x5a3   : > { %9198 = vmatpush3.msra.mxu1 %v6520_v49  ;;  %9199 = vmatprep.mubr.msk.f32.mxu1 %vm9908_vm2, %v11674_v59 }
 0x5a4   : > { %9202 = vmatprep.subr.mxu1 %v11674_v59 }
 0x5aa   : > { %9200 = vmatmul.mubr.f32.vlgmr.msra.gmra.mrb[38].mxu1 %v6587_v58 }
 0x5ab   : > { %9203 = vmatpush3.msra.mxu1 %v6598_v50  ;;  %9204 = vmatprep.mubr.msk.f32.mxu1 %vm9908_vm2, %v11674_v59 }
 0x5ac   : > { %9207 = vmatprep.subr.mxu1 %v11674_v59 }
 0x5b2   : > { %9205 = vmatmul.mubr.f32.vlgmr.msra.gmra.mrb[38].mxu1 %v6585_v38 }
 0x5b3   : > { %9208 = vmatpush3.msra.mxu1 %v6520_v49  ;;  %9209 = vmatprep.mubr.msk.f32.mxu1 %vm9908_vm2, %v11674_v59 }
 0x5b4   : > { %9242 = vmatprep.subr.mxu1 %v11674_v59 }
 0x5ba   : > { %9210 = vmatmul.mubr.f32.vlgmr.msra.gmra.mrb[38].mxu1 %v6585_v38 }
 0x5bb   : > { %9243 = vmatpush3.msra.mxu1 %v7418_v12  ;;  %9244 = vmatprep.mubr.msk.f32.mxu1 %vm9908_vm2, %v11674_v59 }
 0x5bc   : > { %9247 = vmatprep.subr.mxu1 %v11674_v59 }
 0x5be   : > { %9245 = vmatmul.mubr.f32.vlgmr.msra.gmra.mrb[40].mxu1 %v7487_v18 }
 0x5bf   : > { %9248 = vmatpush3.msra.mxu1 %v7498_v22  ;;  %9249 = vmatprep.mubr.msk.f32.mxu1 %vm9908_vm2, %v11674_v59 }
 0x5c0   : > { %9252 = vmatprep.subr.mxu1 %v11674_v59 }
 0x5c6   : > { %9250 = vmatmul.mubr.f32.vlgmr.msra.gmra.mrb[40].mxu1 %v7483_v61 }
 0x5c7   : > { %9253 = vmatpush3.msra.mxu1 %v7495_v36  ;;  %9254 = vmatprep.mubr.msk.f32.mxu1 %vm9908_vm2, %v11674_v59 }
 0x5c8   : > { %9257 = vmatprep.subr.mxu1 %v11674_v59 }
 0x5ce   : > { %9255 = vmatmul.mubr.f32.vlgmr.msra.gmra.mrb[40].mxu1 %v7484_v51 }
 0x5cf   : > { %9258 = vmatpush3.msra.mxu1 %v7418_v12  ;;  %9259 = vmatprep.mubr.msk.f32.mxu1 %vm9908_vm2, %v11674_v59 }
 0x5d0   : > { %9262 = vmatprep.subr.mxu1 %v11674_v59 }
 0x5d6   : > { %9260 = vmatmul.mubr.f32.vlgmr.msra.gmra.mrb[40].mxu1 %v7485_v15 }
 0x5d7   : > { %9263 = vmatpush3.msra.mxu1 %v7496_v42  ;;  %9264 = vmatprep.mubr.msk.f32.mxu1 %vm9908_vm2, %v11674_v59 }
 0x5d8   : > { %9267 = vmatprep.subr.mxu1 %v11674_v59 }
 0x5de   : > { %9265 = vmatmul.mubr.f32.vlgmr.msra.gmra.mrb[40].mxu1 %v7483_v61 }
 0x5df   : > { %9268 = vmatpush3.msra.mxu1 %v7418_v12  ;;  %9269 = vmatprep.mubr.msk.f32.mxu1 %vm9908_vm2, %v11674_v59 }
 0x5e6   : > { %9270 = vmatmul.mubr.f32.vlgmr.msra.gmra.mrb[40].mxu1 %v7483_v61 }
 0x609   : > { %v4716_v57 = vpop.f32.mrb[32].mxu1 }
 0x60a   : > { %v7863_v27 = vmax.f32 %v4716_v57, 0.0  ;;  %v9061_v11 = vpop.f32.mrb[33].mxu1 }
 0x60c   : > { %7871 = vst.msk [vmem:[%s11375_s23] sm:$0xff] %vm1314_vm1, %v7863_v27 }
 0x611   : > { %v5614_v24 = vpop.f32.mrb[16].mxu0 }
 0x612   : > { %v7865_v3 = vmax.f32 %v5614_v24, 0.0  ;;  %v9121_v62 = vpop.f32.mrb[17].mxu0 }
 0x614   : > { %7873 = vst.msk [vmem:[%s11375_s23 + $0x10] sm:$0xff] %vm1314_vm1, %v7865_v3 }
 0x635   : > { %v5165_v59 = vpop.f32.mrb[34].mxu1 }
 0x636   : > { %v7864_v32 = vmax.f32 %v5165_v59, 0.0  ;;  %v9091_v54 = vpop.f32.mrb[35].mxu1 }
 0x638   : > { %7872 = vst.msk [vmem:[%s11375_s23 + $0x8] sm:$0xff] %vm1314_vm1, %v7864_v32 }
 0x63d   : > { %v6512_v0 = vpop.f32.mrb[18].mxu0 }
 0x63e   : > { %v7867_v1 = vmax.f32 %v6512_v0, 0.0  ;;  %v9181_v5 = vpop.f32.mrb[19].mxu0 }
 0x640   : > { %7875 = vst.msk [vmem:[%s11375_s23 + $0x20] sm:$0xff] %vm1314_vm1, %v7867_v1 }
 0x641   : > { %9764 = shalt.err (!%p9761_p3)
}
 0x642   : > { %s9765_s25 = scalar_lea.hbm %s11392_s1, 1024  ;;  %s9769_s0 = scalar_lea.hbm %s11569_s11, 2048 }
 0x643   : > { %p9766_p4 = scmp.ne.s32.totalorder %s11392_s1, %s9765_s25  ;;  %p9770_p9 = scmp.lt.u32.totalorder %s11392_s1, %s11569_s11 }
 0x644   : > { %p9771_p10 = scmp.lt.u32.totalorder %s9769_s0, %s9765_s25  ;;  %p9773_p12 = scmp.lt.u32.totalorder %s9765_s25, %s11392_s1 }
 0x645   : > { %p9767_p7 = pnand %p9766_p4, %p10030_p5 }
 0x646   : > { %p9772_p11 = por %p9771_p10, %p9770_p9 }
 0x647   : > { %p9768_p8 = pneg %p9767_p7 }
 0x648   : > { %p9774_p13 = por %p9773_p12, %p9772_p11 }
 0x64a   : > { %p9775_p0 = pnand %p9774_p13, %p9768_p8 }
 0x64c   : > { %9778 = shalt.err (!%p9775_p0)
}
 0x64d   : > { %s9912_s21 = smov 128   ;;  %s9913_s3 = smov 8  }
 0x64e   : > { %9673 = dma.vmem_to_hbm [thread:$0]  (%p10030_p5), %s11399_s2, 1024, %s11392_s1, %s11401_s9, %s9912_s21, %s9912_s21, %s9913_s3  }
 0x64f   : > { %s11432_s17 = scalar_lea.hbm %s11570_s12, %s11386_s26  ;;  %s9779_s25 = scalar_lea.vmem %s11395_s24, 1024 }
 0x650   : > { %p9780_p1 = scmp.ne.s32.totalorder %s11395_s24, %s9779_s25  ;;  %s9914_s0 = smov [#allocation7]  }
 0x651   : > { %s9783_s16 = sshll.u32 %s9914_s0, 4  ;;  %s9784_s16 = int_to_ptr.vmem [resolvable:$false] %s9783_s16 }
 0x652   : > { %p9781_p2 = pnand %p9780_p1, %p10030_p5  ;;  %s9785_s6 = scalar_lea.vmem %s9784_s16, 2048 }
 0x653   : > { %p9786_p4 = scmp.lt.s32.totalorder %s11395_s24, %s9784_s16  ;;  %p9787_p7 = scmp.lt.s32.totalorder %s9785_s6, %s9779_s25 }
 0x654   : > { %p9782_p3 = pneg %p9781_p2 }
 0x655   : > { %p9788_p8 = por %p9787_p7, %p9786_p4 }
 0x657   : > { %p9789_p9 = pnand %p9788_p8, %p9782_p3 }
 0x659   : > { %9792 = shalt.err (!%p9789_p9)
}
 0x65a   : > { %s9793_s1 = scalar_lea.hbm %s11432_s17, 1024  ;;  %s9797_s5 = scalar_lea.hbm %s11570_s12, 2048 }
 0x65b   : > { %p9794_p10 = scmp.ne.s32.totalorder %s11432_s17, %s9793_s1  ;;  %p9798_p13 = scmp.lt.u32.totalorder %s11432_s17, %s11570_s12 }
 0x65c   : > { %p9799_p0 = scmp.lt.u32.totalorder %s9797_s5, %s9793_s1  ;;  %p9801_p2 = scmp.lt.u32.totalorder %s9793_s1, %s11432_s17 }
 0x65d   : > { %p9795_p11 = pnand %p9794_p10, %p10030_p5 }
 0x65e   : > { %p9800_p1 = por %p9799_p0, %p9798_p13 }
 0x65f   : > { %p9796_p12 = pneg %p9795_p11 }
 0x660   : > { %p9802_p3 = por %p9801_p2, %p9800_p1 }
 0x662   : > { %p9803_p4 = pnand %p9802_p3, %p9796_p12 }
 0x664   : > { %9806 = shalt.err (!%p9803_p4)
}
 0x665   : > { %9674 = dma.vmem_to_hbm [thread:$0]  (%p10030_p5), %s11395_s24, 1024, %s11432_s17, %s11401_s9, %s9912_s21, %s9912_s21, %s9913_s3  }
 0x666   : > { %s11463_s1 = scalar_lea.hbm %s11571_s13, %s11386_s26  ;;  %s7980_s2 = sshll.u32 %s11091_s22, 4  ;;  %s11466_s2 = int_to_ptr.vmem [resolvable:$true] %s7980_s2 }
 0x667   : > { %s7919_s4 = scalar_lea.sflag [#allocation9], %s10993_s14  ;;  %s9807_s5 = scalar_lea.vmem %s11466_s2, 1024 }
 0x668   : > { %p9808_p7 = scmp.ne.s32.totalorder %s11466_s2, %s9807_s5  ;;  %s9915_s0 = smov [#allocation8]  }
 0x669   : > { %s9811_s16 = sshll.u32 %s9915_s0, 4  ;;  %s9812_s16 = int_to_ptr.vmem [resolvable:$false] %s9811_s16 }
 0x66a   : > { %p9809_p8 = pnand %p9808_p7, %p10030_p5  ;;  %s9813_s24 = scalar_lea.vmem %s9812_s16, 2048 }
 0x66b   : > { %p9814_p10 = scmp.lt.s32.totalorder %s11466_s2, %s9812_s16  ;;  %p9815_p11 = scmp.lt.s32.totalorder %s9813_s24, %s9807_s5 }
 0x66c   : > { %p9810_p9 = pneg %p9809_p8 }
 0x66d   : > { %p9816_p12 = por %p9815_p11, %p9814_p10 }
 0x66f   : > { %p9817_p13 = pnand %p9816_p12, %p9810_p9 }
 0x671   : > { %9820 = shalt.err (!%p9817_p13)
}
 0x672   : > { %s9821_s22 = scalar_lea.hbm %s11463_s1, 1024  ;;  %s9825_s6 = scalar_lea.hbm %s11571_s13, 2048 }
 0x673   : > { %p9822_p0 = scmp.ne.s32.totalorder %s11463_s1, %s9821_s22  ;;  %p9826_p3 = scmp.lt.u32.totalorder %s11463_s1, %s11571_s13 }
 0x674   : > { %p9827_p4 = scmp.lt.u32.totalorder %s9825_s6, %s9821_s22  ;;  %p9829_p8 = scmp.lt.u32.totalorder %s9821_s22, %s11463_s1 }
 0x675   : > { %p9823_p1 = pnand %p9822_p0, %p10030_p5 }
 0x676   : > { %p9828_p7 = por %p9827_p4, %p9826_p3 }
 0x677   : > { %p9824_p2 = pneg %p9823_p1 }
 0x678   : > { %p9830_p9 = por %p9829_p8, %p9828_p7 }
 0x67a   : > { %p9831_p10 = pnand %p9830_p9, %p9824_p2 }
 0x67c   : > { %9834 = shalt.err (!%p9831_p10)
}
 0x67d   : > { %9675 = dma.vmem_to_hbm [thread:$0]  (%p10030_p5), %s11466_s2, 1024, %s11463_s1, %s7919_s4, %s9912_s21, %s9912_s21, %s9913_s3   ;;  %v6063_v8 = vpop.f32.mrb[36].mxu1  ;;  %v7410_v41 = vpop.f32.mrb[20].mxu0 }
 0x67e   : > { %v7866_v7 = vmax.f32 %v6063_v8, 0.0  ;;  %v9151_v29 = vpop.f32.mrb[37].mxu1  ;;  %v7869_v47 = vmax.f32 %v7410_v41, 0.0  ;;  %v9241_v48 = vpop.f32.mrb[21].mxu0  ;;  %s7932_s1 = sshll.u32 %s11375_s23, 4  ;;  %s11506_s5 = scalar_lea.hbm %s11568_s10, %s11386_s26  ;;  %s11508_s1 = int_to_ptr.vmem [resolvable:$true] %s7932_s1 }
 0x67f   : > { %s7904_s16 = scalar_lea.sflag [#allocation4], %s10993_s14  ;;  %s9835_s24 = scalar_lea.vmem %s11508_s1, 1024 }
 0x680   : > { %7874 = vst.msk [vmem:[%s11375_s23 + $0x18] sm:$0xff] %vm1314_vm1, %v7866_v7  ;;  %7877 = vst.msk [vmem:[%s11375_s23 + $0x30] sm:$0xff] %vm1314_vm1, %v7869_v47  ;;  %p9836_p11 = scmp.ne.s32.totalorder %s11508_s1, %s9835_s24  ;;  %s9916_s22 = smov [#allocation3]  }
 0x681   : > { %s9839_s9 = sshll.u32 %s9916_s22, 4  ;;  %s9840_s9 = int_to_ptr.vmem [resolvable:$false] %s9839_s9 }
 0x682   : > { %p9837_p12 = pnand %p9836_p11, %p10030_p5  ;;  %s9841_s17 = scalar_lea.vmem %s9840_s9, 2048 }
 0x683   : > { %p9842_p0 = scmp.lt.s32.totalorder %s11508_s1, %s9840_s9  ;;  %p9843_p1 = scmp.lt.s32.totalorder %s9841_s17, %s9835_s24 }
 0x684   : > { %p9838_p13 = pneg %p9837_p12 }
 0x685   : > { %p9844_p2 = por %p9843_p1, %p9842_p0 }
 0x687   : > { %p9845_p3 = pnand %p9844_p2, %p9838_p13 }
 0x68d   : > { %v6961_v20 = vpop.f32.mrb[38].mxu1 }
 0x68e   : > { %v7868_v31 = vmax.f32 %v6961_v20, 0.0  ;;  %v9211_v55 = vpop.f32.mrb[39].mxu1 }
 0x690   : > { %7876 = vst.msk [vmem:[%s11375_s23 + $0x28] sm:$0xff] %vm1314_vm1, %v7868_v31 }
 0x6b9   : > { %v7859_v4 = vpop.f32.mrb[40].mxu1 }
 0x6ba   : > { %v7870_v45 = vmax.f32 %v7859_v4, 0.0  ;;  %v9271_v13 = vpop.f32.mrb[41].mxu1 }
 0x6bc   : > { %7878 = vst.msk [vmem:[%s11375_s23 + $0x38] sm:$0xff] %vm1314_vm1, %v7870_v45 }
 0x6bd   : > { %9848 = shalt.err (!%p9845_p3)
}
 0x6be   : > { %s9849_s23 = scalar_lea.hbm %s11506_s5, 1024  ;;  %s9853_s25 = scalar_lea.hbm %s11568_s10, 2048 }
 0x6bf   : > { %p9850_p4 = scmp.ne.s32.totalorder %s11506_s5, %s9849_s23  ;;  %p9854_p9 = scmp.lt.u32.totalorder %s11506_s5, %s11568_s10 }
 0x6c0   : > { %p9855_p10 = scmp.lt.u32.totalorder %s9853_s25, %s9849_s23  ;;  %p9857_p12 = scmp.lt.u32.totalorder %s9849_s23, %s11506_s5 }
 0x6c1   : > { %p9851_p7 = pnand %p9850_p4, %p10030_p5 }
 0x6c2   : > { %p9856_p11 = por %p9855_p10, %p9854_p9 }
 0x6c3   : > { %p9852_p8 = pneg %p9851_p7 }
 0x6c4   : > { %p9858_p13 = por %p9857_p12, %p9856_p11 }
 0x6c6   : > { %p9859_p0 = pnand %p9858_p13, %p9852_p8 }
 0x6c8   : > { %9862 = shalt.err (!%p9859_p0)
}
 0x6c9   : > { %9672 = dma.vmem_to_hbm [thread:$0]  (%p10030_p5), %s11508_s1, 1024, %s11506_s5, %s7904_s16, %s9912_s21, %s9912_s21, %s9913_s3  }
 0x6ca PF: > { %p9693_p1 = scmp.ge.s32.totalorder %s9905_s30, 2  ;;  %s7995_s4 = sand.u32 1, %s9893_s27  }
 0x6cb   : > { %s7996_s24 = scalar_lea.sflag [#allocation4], %s7995_s4 }
 0x6cc   : > { %p9681_p2 = pnand %p9693_p1, %p10034_p6 }
 0x6ce   : > { %9880 = dma.done.wait (!%p9681_p2), %s7996_s24, 1024  }
 0x6cf   : > { %9882 = vsyncadd (!%p9681_p2), %s7996_s24, 4294966272  ;;  %s11683_s19 = sadd.s32 4294967294, %s9905_s30  }
 0x6d0   : > { %s8004_s22 = sand.u32 1, %s11683_s19  }
 0x6d1   : > { %s8005_s9 = scalar_lea.sflag [#allocation6], %s8004_s22 }
 0x6d2   : > { %9884 = dma.done.wait (!%p9681_p2), %s8005_s9, 2048  }
 0x6d3   : > { %9886 = vsyncadd (!%p9681_p2), %s8005_s9, 4294965248  ;;  %s8023_s14 = scalar_lea.sflag [#allocation9], %s7995_s4 }
 0x6d4   : > { %9888 = dma.done.wait (!%p9681_p2), %s8023_s14, 1024  }
 0x6d5   : > { %9890 = vsyncadd (!%p9681_p2), %s8023_s14, 4294966272  ;;  %p32_p5 = scmp.ge.s32.totalorder %s10015_s15, 4   ;;  %s11684_s27 = smov %s9897_s28 }
 0x6d6   : > { %s11685_s28 = smov %s9901_s29  ;;  %s11686_s29 = smov %s10028_s18 }
 0x6d7   : > { %s11687_s30 = smov %s10015_s15  ;;  %34 = sbr.rel (!%p32_p5) target bundleno = 15 (0xf), region = 144 }
 0x6de   :  { %8028 = vsyncpa [#allocation4], 1 }
 0x6df   :  { %8030 = vsyncpa [#allocation4 + $0x1], 1 }
 0x6e0   :  { %8031 = vsyncpa [#allocation6], 1 }
 0x6e1   :  { %8033 = vsyncpa [#allocation6 + $0x1], 1 }
 0x6e2   :  { %8034 = vsyncpa [#allocation9], 1 }
 0x6e3   :  { %8036 = vsyncpa [#allocation9 + $0x1], 1 }

</bundles_post_ra>
